<compile_context>
chip_gen: v7x
topology: tpu7x:2x2x1
jax: 0.10.0
libtpu: 0.0.40
codegen_flags: <defaults>
</compile_context>

<pallas_src>
import jax
import jax.numpy as jnp
from jax import lax
from jax.experimental import pallas as pl
from jax.experimental.pallas import tpu as pltpu


def _prompt_encoder_kernel(x_ref, w_ih0_ref, w_hh0_ref, b0_ref,
                           w_ih1_ref, w_hh1_ref, b1_ref,
                           w_mlp_ref, b_mlp_ref, out_ref):
    """2-layer bidirectional LSTM + Linear + residual, everything kept in vregs.

    Packed gate-lane layout (G = 8*Hh lanes): [i_f, i_b, f_f, f_b, o_f, o_b, g_f, g_b],
    Hh lanes per block.  Packed state layout (H = 2*Hh lanes): [fwd | bwd].
    Weights arrive pre-packed & pre-cast to bf16; biases (b_ih + b_hh) arrive in f32.
    """
    L, H = x_ref.shape
    Hh = H // 2
    G = 8 * Hh

    x_val = x_ref[...]                                           # (L, H) f32: residual + layer-0 input

    # ---- constants hoisted above both layer loops (JAX does not CSE broadcasts) ----
    gate_lane = lax.broadcasted_iota(jnp.int32, (1, G), 1)
    fwd_gate_mask = (gate_lane % (2 * Hh)) < Hh                  # fwd lanes of the packed gate vector
    out_lane = lax.broadcasted_iota(jnp.int32, (1, H), 1)
    fwd_half_mask = out_lane < Hh                                # fwd half of a timestep output

    sig_lane = gate_lane < 6 * Hh                                # [i|f|o] lanes -> sigmoid, [g] -> tanh
    pre_scale = jnp.where(sig_lane, 0.5, 1.0)                    # fused activation: one EUP push/step
    post_scale = pre_scale
    act_offset = jnp.where(sig_lane, 0.5, 0.0)

    def rev_rows(m):
        # Exact time (sublane) reversal, built from static slices; off the critical path.
        return jnp.concatenate([m[L - 1 - s:L - s, :] for s in range(L)], axis=0)

    layer_params = ((w_ih0_ref, w_hh0_ref, b0_ref),
                    (w_ih1_ref, w_hh1_ref, b1_ref))

    layer_in = x_val                                             # (L, H) f32
    for w_ih_ref, w_hh_ref, b_ref in layer_params:
        w_hh = w_hh_ref[...]                                     # (H, G) bf16, vreg-resident

        # Input projection for all timesteps & both directions: one bf16 MXU push per layer.
        xproj = lax.dot_general(
            layer_in.astype(jnp.bfloat16), w_ih_ref[...],
            (((1,), (0,)), ((), ())),
            preferred_element_type=jnp.float32) + b_ref[...]     # (L, G) f32

        # fwd gate lanes read time s, bwd gate lanes read time L-1-s: one reverse + one select.
        xs_all = jnp.where(fwd_gate_mask, xproj, rev_rows(xproj))   # (L, G)

        h = jnp.zeros((1, H), jnp.float32)                       # [h_fwd | h_bwd]
        c = jnp.zeros((1, H), jnp.float32)                       # [c_fwd | c_bwd]
        h_steps = []
        for s in range(L):                                       # L is small -> static unroll
            gates = xs_all[s:s + 1, :] + lax.dot_general(
                h.astype(jnp.bfloat16), w_hh, (((1,), (0,)), ((), ())),
                preferred_element_type=jnp.float32)              # (1, G) f32

            # One fused tanh over all 128 lanes: sigmoid on i/f/o lanes, tanh on g lanes.
            act = post_scale * jnp.tanh(gates * pre_scale) + act_offset
            i_g = act[:, 0:2 * Hh]
            f_g = act[:, 2 * Hh:4 * Hh]
            o_g = act[:, 4 * Hh:6 * Hh]
            g_g = act[:, 6 * Hh:]

            c = f_g * c + i_g * g_g                              # f32 elementwise (v5e-safe)
            h = o_g * jnp.tanh(c)
            h_steps.append(h)

        # Time-ordered bidirectional output: row t = [h_fwd(t) | h_bwd(t)];
        # h_bwd(t) was produced at step L-1-t  ->  one reverse + one full-block select.
        h_all = jnp.concatenate(h_steps, axis=0)                 # (L, H)
        layer_in = jnp.where(fwd_half_mask, h_all, rev_rows(h_all))

    # mlp_head (Linear H->H, weight pre-transposed & pre-cast host-side) + residual.
    y = lax.dot_general(
        layer_in.astype(jnp.bfloat16), w_mlp_ref[...],
        (((1,), (0,)), ((), ())),
        preferred_element_type=jnp.float32) + b_mlp_ref[...]
    out_ref[...] = y + x_val


def _pack_lstm_layer(w_ih_l, w_hh_l, b_l, Hh):
    """Repack one layer's PyTorch-layout weights into the kernel's packed lane layout.

    Inputs (per layer):
      w_ih_l: (2, 4*Hh, in)   per-direction input weights, PyTorch gate order i,f,g,o
      w_hh_l: (2, 4*Hh, Hh)   per-direction recurrent weights
      b_l:    (2, 1, 4*Hh)    per-direction combined bias (b_ih + b_hh)
    Outputs (MXU-ready):
      W_ih_packed: (in, 8*Hh)   bf16, gate columns = [i_f,i_b,f_f,f_b,o_f,o_b,g_f,g_b]
      W_hh_packed: (2*Hh, 8*Hh) bf16, block-diagonal (rows 0:Hh = h_fwd, rows Hh:2Hh = h_bwd)
      b_packed:    (1, 8*Hh)    f32
    """
    def gate_rows(w, g):
        return w[g * Hh:(g + 1) * Hh, :]

    # (pytorch gate index, direction) in packed column order; PyTorch gate order = i,f,g,o.
    order = [(0, 0), (0, 1), (1, 0), (1, 1), (3, 0), (3, 1), (2, 0), (2, 1)]

    w_ih_packed = jnp.concatenate(
        [gate_rows(w_ih_l[d], g).T for (g, d) in order], axis=1)
    b_packed = jnp.concatenate(
        [b_l[d][:, g * Hh:(g + 1) * Hh] for (g, d) in order], axis=1)

    zero = jnp.zeros((Hh, Hh), jnp.float32)
    top, bot = [], []
    for (g, d) in order:
        blk = gate_rows(w_hh_l[d], g).T                          # (Hh, Hh): rows=h, cols=gate
        top.append(blk if d == 0 else zero)
        bot.append(zero if d == 0 else blk)
    w_hh_packed = jnp.concatenate(
        [jnp.concatenate(top, axis=1), jnp.concatenate(bot, axis=1)], axis=0)

    return (w_ih_packed.astype(jnp.bfloat16),
            w_hh_packed.astype(jnp.bfloat16),
            b_packed.astype(jnp.float32))


def make_prompt_encoder(w_ih, w_hh, b, w_mlp, b_mlp):
    """Pack weights ONCE (init-time) and return a jitted forward(x) with no per-call repacking."""
    Hh = w_hh.shape[-1]

    w_ih0, w_hh0, b0 = _pack_lstm_layer(w_ih[0], w_hh[0], b[0], Hh)
    w_ih1, w_hh1, b1 = _pack_lstm_layer(w_ih[1], w_hh[1], b[1], Hh)
    packed = (w_ih0, w_hh0, b0, w_ih1, w_hh1, b1,
              w_mlp.T.astype(jnp.bfloat16), b_mlp.astype(jnp.float32))
    packed = tuple(jax.block_until_ready(p) for p in packed)     # materialize packing at init

    vmem = pl.BlockSpec(memory_space=pltpu.MemorySpace.VMEM)

    @jax.jit
    def forward(x):
        L, H = x.shape
        return pl.pallas_call(
            _prompt_encoder_kernel,
            out_shape=jax.ShapeDtypeStruct((L, H), jnp.float32),
            in_specs=[vmem] * 9,
            out_specs=vmem,
        )(x, *packed)

    return forward


def _sigmoid_ref(x):
    return 1.0 / (1.0 + jnp.exp(-x))


def prompt_encoder_ref(x, w_ih, w_hh, b, w_mlp, b_mlp):
    """Pure-JAX f32 reference with PyTorch-identical math (correctness check)."""
    L, H = x.shape
    Hh = H // 2
    layer_in = x
    for layer in range(2):
        dir_outs = []
        for d in range(2):
            proj = layer_in @ w_ih[layer, d].T + b[layer, d]
            h = jnp.zeros((1, Hh), jnp.float32)
            c = jnp.zeros((1, Hh), jnp.float32)
            outs = [None] * L
            order = range(L) if d == 0 else range(L - 1, -1, -1)
            for t in order:
                gates = proj[t:t + 1] + h @ w_hh[layer, d].T
                i_g = _sigmoid_ref(gates[:, 0 * Hh:1 * Hh])
                f_g = _sigmoid_ref(gates[:, 1 * Hh:2 * Hh])
                g_g = jnp.tanh(gates[:, 2 * Hh:3 * Hh])
                o_g = _sigmoid_ref(gates[:, 3 * Hh:4 * Hh])
                c = f_g * c + i_g * g_g
                h = o_g * jnp.tanh(c)
                outs[t] = h
            dir_outs.append(jnp.concatenate(outs, axis=0))
        layer_in = jnp.concatenate(dir_outs, axis=-1)
    return layer_in @ w_mlp.T + b_mlp + x


if __name__ == "__main__":
    # template=(4,4) -> spell_length L = 8; hidden_size H = 32
    L, H = 8, 32
    Hh = H // 2

    key = jax.random.PRNGKey(0)
    k_x, k_wih, k_whh, k_b, k_wm, k_bm = jax.random.split(key, 6)

    k_lstm = 1.0 / jnp.sqrt(jnp.float32(Hh))
    k_lin = 1.0 / jnp.sqrt(jnp.float32(H))

    # Deterministic synthetic parameters (PyTorch-default-style uniform init).
    # Bias convention: already combined (b_ih + b_hh) per direction, as the kernel expects.
    w_ih = jax.random.uniform(k_wih, (2, 2, 4 * Hh, H), jnp.float32, -k_lstm, k_lstm)
    w_hh = jax.random.uniform(k_whh, (2, 2, 4 * Hh, Hh), jnp.float32, -k_lstm, k_lstm)
    b = jax.random.uniform(k_b, (2, 2, 1, 4 * Hh), jnp.float32, -k_lstm, k_lstm)
    w_mlp = jax.random.uniform(k_wm, (H, H), jnp.float32, -k_lin, k_lin)
    b_mlp = jax.random.uniform(k_bm, (1, H), jnp.float32, -k_lin, k_lin)

    x = jax.random.normal(k_x, (L, H), jnp.float32)

    encoder = make_prompt_encoder(w_ih, w_hh, b, w_mlp, b_mlp)   # weight packing happens here, once
    out = encoder(x)
    out = jax.block_until_ready(out)

    ref = prompt_encoder_ref(x, w_ih, w_hh, b, w_mlp, b_mlp)
    assert out.shape == (L, H)
    # bf16 MXU operands (single-pass, f32 accumulate) set the accuracy floor vs the pure-f32
    # reference; observed error is ~1e-3 level, well inside this tolerance.
    assert jnp.allclose(out, ref, atol=1e-2, rtol=1e-2), "Pallas kernel mismatch vs reference"

    print("KERNEL_OK")
</pallas_src>

<mosaic_0001>
module attributes {stable_mosaic.version = 11 : i64} {
  func.func @_prompt_encoder_kernel(%arg0: memref<8x32xf32, #tpu.memory_space<vmem>>, %arg1: memref<32x128xbf16, #tpu.memory_space<vmem>>, %arg2: memref<32x128xbf16, #tpu.memory_space<vmem>>, %arg3: memref<1x128xf32, #tpu.memory_space<vmem>>, %arg4: memref<32x128xbf16, #tpu.memory_space<vmem>>, %arg5: memref<32x128xbf16, #tpu.memory_space<vmem>>, %arg6: memref<1x128xf32, #tpu.memory_space<vmem>>, %arg7: memref<32x32xbf16, #tpu.memory_space<vmem>>, %arg8: memref<1x32xf32, #tpu.memory_space<vmem>>, %arg9: memref<8x32xf32, #tpu.memory_space<vmem>>) attributes {dimension_semantics = [], scalar_prefetch = 0 : i64, scratch_operands = 0 : i64, tpu.core_type = #tpu.core_type<tc>} {
    %c0 = arith.constant 0 : index
    %c0_0 = arith.constant 0 : index
    %0 = vector.load %arg0[%c0, %c0_0] : memref<8x32xf32, #tpu.memory_space<vmem>>, vector<8x32xf32>
    %1 = tpu.iota {dimensions = array<i32: 1>} : vector<1x128xi32>
    %c32_i32 = arith.constant 32 : i32
    %c0_i32 = arith.constant 0 : i32
    %2 = arith.cmpi eq, %c32_i32, %c0_i32 : i32
    %c1_i32 = arith.constant 1 : i32
    %3 = arith.select %2, %c1_i32, %c32_i32 : i32
    %4 = vector.broadcast %3 : i32 to vector<1x128xi32>
    %5 = arith.remsi %1, %4 : vector<1x128xi32>
    %c0_i32_1 = arith.constant 0 : i32
    %6 = vector.broadcast %c0_i32_1 : i32 to vector<1x128xi32>
    %7 = arith.cmpi ne, %5, %6 : vector<1x128xi32>
    %c0_i32_2 = arith.constant 0 : i32
    %8 = vector.broadcast %c0_i32_2 : i32 to vector<1x128xi32>
    %9 = arith.cmpi slt, %5, %8 : vector<1x128xi32>
    %c0_i32_3 = arith.constant 0 : i32
    %10 = arith.cmpi slt, %3, %c0_i32_3 : i32
    %11 = vector.broadcast %10 : i1 to vector<1x128xi1>
    %12 = vector.broadcast %11 : vector<1x128xi1> to vector<1x128xi1>
    %13 = arith.xori %9, %12 : vector<1x128xi1>
    %14 = arith.andi %13, %7 : vector<1x128xi1>
    %15 = vector.broadcast %3 : i32 to vector<1x128xi32>
    %16 = arith.addi %5, %15 : vector<1x128xi32>
    %17 = arith.select %14, %16, %5 : vector<1x128xi1>, vector<1x128xi32>
    %c16_i32 = arith.constant 16 : i32
    %18 = vector.broadcast %c16_i32 : i32 to vector<1x128xi32>
    %19 = arith.cmpi slt, %17, %18 : vector<1x128xi32>
    %20 = tpu.iota {dimensions = array<i32: 1>} : vector<1x32xi32>
    %c16_i32_4 = arith.constant 16 : i32
    %21 = vector.broadcast %c16_i32_4 : i32 to vector<1x32xi32>
    %22 = arith.cmpi slt, %20, %21 : vector<1x32xi32>
    %c96_i32 = arith.constant 96 : i32
    %23 = vector.broadcast %c96_i32 : i32 to vector<1x128xi32>
    %24 = arith.cmpi slt, %1, %23 : vector<1x128xi32>
    %cst = arith.constant 5.000000e-01 : f32
    %cst_5 = arith.constant 1.000000e+00 : f32
    %25 = vector.broadcast %cst : f32 to vector<1x128xf32>
    %26 = vector.broadcast %cst_5 : f32 to vector<1x128xf32>
    %27 = arith.select %24, %25, %26 : vector<1x128xi1>, vector<1x128xf32>
    %cst_6 = arith.constant 5.000000e-01 : f32
    %cst_7 = arith.constant 0.000000e+00 : f32
    %28 = vector.broadcast %cst_6 : f32 to vector<1x128xf32>
    %29 = vector.broadcast %cst_7 : f32 to vector<1x128xf32>
    %30 = arith.select %24, %28, %29 : vector<1x128xi1>, vector<1x128xf32>
    %c0_8 = arith.constant 0 : index
    %c0_9 = arith.constant 0 : index
    %31 = vector.load %arg2[%c0_8, %c0_9] : memref<32x128xbf16, #tpu.memory_space<vmem>>, vector<32x128xbf16>
    %32 = arith.truncf %0 : vector<8x32xf32> to vector<8x32xbf16>
    %c0_10 = arith.constant 0 : index
    %c0_11 = arith.constant 0 : index
    %33 = vector.load %arg1[%c0_10, %c0_11] : memref<32x128xbf16, #tpu.memory_space<vmem>>, vector<32x128xbf16>
    %cst_12 = arith.constant dense<0.000000e+00> : vector<8x128xf32>
    %34 = tpu.matmul %32, %33, %cst_12 {dimension_numbers = #tpu.dot_dimension_numbers<[1], [0], [0], [1], [0, 0, 1, 1], [], []>} : vector<8x32xbf16>, vector<32x128xbf16>, vector<8x128xf32> -> vector<8x128xf32>
    %c0_13 = arith.constant 0 : index
    %c0_14 = arith.constant 0 : index
    %35 = vector.load %arg3[%c0_13, %c0_14] : memref<1x128xf32, #tpu.memory_space<vmem>>, vector<1x128xf32>
    %36 = vector.broadcast %35 : vector<1x128xf32> to vector<8x128xf32>
    %37 = arith.addf %34, %36 : vector<8x128xf32>
    %38 = vector.extract_strided_slice %37 {offsets = [7, 0], sizes = [1, 128], strides = [1, 1]} : vector<8x128xf32> to vector<1x128xf32>
    %39 = vector.extract_strided_slice %37 {offsets = [6, 0], sizes = [1, 128], strides = [1, 1]} : vector<8x128xf32> to vector<1x128xf32>
    %40 = vector.extract_strided_slice %37 {offsets = [5, 0], sizes = [1, 128], strides = [1, 1]} : vector<8x128xf32> to vector<1x128xf32>
    %41 = vector.extract_strided_slice %37 {offsets = [4, 0], sizes = [1, 128], strides = [1, 1]} : vector<8x128xf32> to vector<1x128xf32>
    %42 = vector.extract_strided_slice %37 {offsets = [3, 0], sizes = [1, 128], strides = [1, 1]} : vector<8x128xf32> to vector<1x128xf32>
    %43 = vector.extract_strided_slice %37 {offsets = [2, 0], sizes = [1, 128], strides = [1, 1]} : vector<8x128xf32> to vector<1x128xf32>
    %44 = vector.extract_strided_slice %37 {offsets = [1, 0], sizes = [1, 128], strides = [1, 1]} : vector<8x128xf32> to vector<1x128xf32>
    %45 = vector.extract_strided_slice %37 {offsets = [0, 0], sizes = [1, 128], strides = [1, 1]} : vector<8x128xf32> to vector<1x128xf32>
    %46 = tpu.concatenate %38, %39, %40, %41, %42, %43, %44, %45 in 0 : vector<1x128xf32>, vector<1x128xf32>, vector<1x128xf32>, vector<1x128xf32>, vector<1x128xf32>, vector<1x128xf32>, vector<1x128xf32>, vector<1x128xf32> -> vector<8x128xf32>
    %47 = vector.shape_cast %19 : vector<1x128xi1> to vector<1x128xi1>
    %48 = vector.broadcast %47 : vector<1x128xi1> to vector<8x128xi1>
    %49 = arith.select %48, %37, %46 : vector<8x128xi1>, vector<8x128xf32>
    %cst_15 = arith.constant 0.000000e+00 : f32
    %50 = vector.broadcast %cst_15 : f32 to vector<1x32xf32>
    %cst_16 = arith.constant 0.000000e+00 : f32
    %51 = vector.broadcast %cst_16 : f32 to vector<1x32xf32>
    %52 = vector.extract_strided_slice %49 {offsets = [0, 0], sizes = [1, 128], strides = [1, 1]} : vector<8x128xf32> to vector<1x128xf32>
    %53 = arith.truncf %50 : vector<1x32xf32> to vector<1x32xbf16>
    %cst_17 = arith.constant dense<0.000000e+00> : vector<1x128xf32>
    %54 = tpu.matmul %53, %31, %cst_17 {dimension_numbers = #tpu.dot_dimension_numbers<[1], [0], [0], [1], [0, 0, 1, 1], [], []>} : vector<1x32xbf16>, vector<32x128xbf16>, vector<1x128xf32> -> vector<1x128xf32>
    %55 = arith.addf %52, %54 : vector<1x128xf32>
    %56 = arith.mulf %55, %27 : vector<1x128xf32>
    %57 = math.tanh %56 : vector<1x128xf32>
    %58 = arith.mulf %27, %57 : vector<1x128xf32>
    %59 = arith.addf %58, %30 : vector<1x128xf32>
    %60 = vector.extract_strided_slice %59 {offsets = [0, 0], sizes = [1, 32], strides = [1, 1]} : vector<1x128xf32> to vector<1x32xf32>
    %61 = vector.extract_strided_slice %59 {offsets = [0, 32], sizes = [1, 32], strides = [1, 1]} : vector<1x128xf32> to vector<1x32xf32>
    %62 = vector.extract_strided_slice %59 {offsets = [0, 64], sizes = [1, 32], strides = [1, 1]} : vector<1x128xf32> to vector<1x32xf32>
    %63 = vector.extract_strided_slice %59 {offsets = [0, 96], sizes = [1, 32], strides = [1, 1]} : vector<1x128xf32> to vector<1x32xf32>
    %64 = arith.mulf %61, %51 : vector<1x32xf32>
    %65 = arith.mulf %60, %63 : vector<1x32xf32>
    %66 = arith.addf %64, %65 : vector<1x32xf32>
    %67 = math.tanh %66 : vector<1x32xf32>
    %68 = arith.mulf %62, %67 : vector<1x32xf32>
    %69 = vector.extract_strided_slice %49 {offsets = [1, 0], sizes = [1, 128], strides = [1, 1]} : vector<8x128xf32> to vector<1x128xf32>
    %70 = arith.truncf %68 : vector<1x32xf32> to vector<1x32xbf16>
    %cst_18 = arith.constant dense<0.000000e+00> : vector<1x128xf32>
    %71 = tpu.matmul %70, %31, %cst_18 {dimension_numbers = #tpu.dot_dimension_numbers<[1], [0], [0], [1], [0, 0, 1, 1], [], []>} : vector<1x32xbf16>, vector<32x128xbf16>, vector<1x128xf32> -> vector<1x128xf32>
    %72 = arith.addf %69, %71 : vector<1x128xf32>
    %73 = arith.mulf %72, %27 : vector<1x128xf32>
    %74 = math.tanh %73 : vector<1x128xf32>
    %75 = arith.mulf %27, %74 : vector<1x128xf32>
    %76 = arith.addf %75, %30 : vector<1x128xf32>
    %77 = vector.extract_strided_slice %76 {offsets = [0, 0], sizes = [1, 32], strides = [1, 1]} : vector<1x128xf32> to vector<1x32xf32>
    %78 = vector.extract_strided_slice %76 {offsets = [0, 32], sizes = [1, 32], strides = [1, 1]} : vector<1x128xf32> to vector<1x32xf32>
    %79 = vector.extract_strided_slice %76 {offsets = [0, 64], sizes = [1, 32], strides = [1, 1]} : vector<1x128xf32> to vector<1x32xf32>
    %80 = vector.extract_strided_slice %76 {offsets = [0, 96], sizes = [1, 32], strides = [1, 1]} : vector<1x128xf32> to vector<1x32xf32>
    %81 = arith.mulf %78, %66 : vector<1x32xf32>
    %82 = arith.mulf %77, %80 : vector<1x32xf32>
    %83 = arith.addf %81, %82 : vector<1x32xf32>
    %84 = math.tanh %83 : vector<1x32xf32>
    %85 = arith.mulf %79, %84 : vector<1x32xf32>
    %86 = vector.extract_strided_slice %49 {offsets = [2, 0], sizes = [1, 128], strides = [1, 1]} : vector<8x128xf32> to vector<1x128xf32>
    %87 = arith.truncf %85 : vector<1x32xf32> to vector<1x32xbf16>
    %cst_19 = arith.constant dense<0.000000e+00> : vector<1x128xf32>
    %88 = tpu.matmul %87, %31, %cst_19 {dimension_numbers = #tpu.dot_dimension_numbers<[1], [0], [0], [1], [0, 0, 1, 1], [], []>} : vector<1x32xbf16>, vector<32x128xbf16>, vector<1x128xf32> -> vector<1x128xf32>
    %89 = arith.addf %86, %88 : vector<1x128xf32>
    %90 = arith.mulf %89, %27 : vector<1x128xf32>
    %91 = math.tanh %90 : vector<1x128xf32>
    %92 = arith.mulf %27, %91 : vector<1x128xf32>
    %93 = arith.addf %92, %30 : vector<1x128xf32>
    %94 = vector.extract_strided_slice %93 {offsets = [0, 0], sizes = [1, 32], strides = [1, 1]} : vector<1x128xf32> to vector<1x32xf32>
    %95 = vector.extract_strided_slice %93 {offsets = [0, 32], sizes = [1, 32], strides = [1, 1]} : vector<1x128xf32> to vector<1x32xf32>
    %96 = vector.extract_strided_slice %93 {offsets = [0, 64], sizes = [1, 32], strides = [1, 1]} : vector<1x128xf32> to vector<1x32xf32>
    %97 = vector.extract_strided_slice %93 {offsets = [0, 96], sizes = [1, 32], strides = [1, 1]} : vector<1x128xf32> to vector<1x32xf32>
    %98 = arith.mulf %95, %83 : vector<1x32xf32>
    %99 = arith.mulf %94, %97 : vector<1x32xf32>
    %100 = arith.addf %98, %99 : vector<1x32xf32>
    %101 = math.tanh %100 : vector<1x32xf32>
    %102 = arith.mulf %96, %101 : vector<1x32xf32>
    %103 = vector.extract_strided_slice %49 {offsets = [3, 0], sizes = [1, 128], strides = [1, 1]} : vector<8x128xf32> to vector<1x128xf32>
    %104 = arith.truncf %102 : vector<1x32xf32> to vector<1x32xbf16>
    %cst_20 = arith.constant dense<0.000000e+00> : vector<1x128xf32>
    %105 = tpu.matmul %104, %31, %cst_20 {dimension_numbers = #tpu.dot_dimension_numbers<[1], [0], [0], [1], [0, 0, 1, 1], [], []>} : vector<1x32xbf16>, vector<32x128xbf16>, vector<1x128xf32> -> vector<1x128xf32>
    %106 = arith.addf %103, %105 : vector<1x128xf32>
    %107 = arith.mulf %106, %27 : vector<1x128xf32>
    %108 = math.tanh %107 : vector<1x128xf32>
    %109 = arith.mulf %27, %108 : vector<1x128xf32>
    %110 = arith.addf %109, %30 : vector<1x128xf32>
    %111 = vector.extract_strided_slice %110 {offsets = [0, 0], sizes = [1, 32], strides = [1, 1]} : vector<1x128xf32> to vector<1x32xf32>
    %112 = vector.extract_strided_slice %110 {offsets = [0, 32], sizes = [1, 32], strides = [1, 1]} : vector<1x128xf32> to vector<1x32xf32>
    %113 = vector.extract_strided_slice %110 {offsets = [0, 64], sizes = [1, 32], strides = [1, 1]} : vector<1x128xf32> to vector<1x32xf32>
    %114 = vector.extract_strided_slice %110 {offsets = [0, 96], sizes = [1, 32], strides = [1, 1]} : vector<1x128xf32> to vector<1x32xf32>
    %115 = arith.mulf %112, %100 : vector<1x32xf32>
    %116 = arith.mulf %111, %114 : vector<1x32xf32>
    %117 = arith.addf %115, %116 : vector<1x32xf32>
    %118 = math.tanh %117 : vector<1x32xf32>
    %119 = arith.mulf %113, %118 : vector<1x32xf32>
    %120 = vector.extract_strided_slice %49 {offsets = [4, 0], sizes = [1, 128], strides = [1, 1]} : vector<8x128xf32> to vector<1x128xf32>
    %121 = arith.truncf %119 : vector<1x32xf32> to vector<1x32xbf16>
    %cst_21 = arith.constant dense<0.000000e+00> : vector<1x128xf32>
    %122 = tpu.matmul %121, %31, %cst_21 {dimension_numbers = #tpu.dot_dimension_numbers<[1], [0], [0], [1], [0, 0, 1, 1], [], []>} : vector<1x32xbf16>, vector<32x128xbf16>, vector<1x128xf32> -> vector<1x128xf32>
    %123 = arith.addf %120, %122 : vector<1x128xf32>
    %124 = arith.mulf %123, %27 : vector<1x128xf32>
    %125 = math.tanh %124 : vector<1x128xf32>
    %126 = arith.mulf %27, %125 : vector<1x128xf32>
    %127 = arith.addf %126, %30 : vector<1x128xf32>
    %128 = vector.extract_strided_slice %127 {offsets = [0, 0], sizes = [1, 32], strides = [1, 1]} : vector<1x128xf32> to vector<1x32xf32>
    %129 = vector.extract_strided_slice %127 {offsets = [0, 32], sizes = [1, 32], strides = [1, 1]} : vector<1x128xf32> to vector<1x32xf32>
    %130 = vector.extract_strided_slice %127 {offsets = [0, 64], sizes = [1, 32], strides = [1, 1]} : vector<1x128xf32> to vector<1x32xf32>
    %131 = vector.extract_strided_slice %127 {offsets = [0, 96], sizes = [1, 32], strides = [1, 1]} : vector<1x128xf32> to vector<1x32xf32>
    %132 = arith.mulf %129, %117 : vector<1x32xf32>
    %133 = arith.mulf %128, %131 : vector<1x32xf32>
    %134 = arith.addf %132, %133 : vector<1x32xf32>
    %135 = math.tanh %134 : vector<1x32xf32>
    %136 = arith.mulf %130, %135 : vector<1x32xf32>
    %137 = vector.extract_strided_slice %49 {offsets = [5, 0], sizes = [1, 128], strides = [1, 1]} : vector<8x128xf32> to vector<1x128xf32>
    %138 = arith.truncf %136 : vector<1x32xf32> to vector<1x32xbf16>
    %cst_22 = arith.constant dense<0.000000e+00> : vector<1x128xf32>
    %139 = tpu.matmul %138, %31, %cst_22 {dimension_numbers = #tpu.dot_dimension_numbers<[1], [0], [0], [1], [0, 0, 1, 1], [], []>} : vector<1x32xbf16>, vector<32x128xbf16>, vector<1x128xf32> -> vector<1x128xf32>
    %140 = arith.addf %137, %139 : vector<1x128xf32>
    %141 = arith.mulf %140, %27 : vector<1x128xf32>
    %142 = math.tanh %141 : vector<1x128xf32>
    %143 = arith.mulf %27, %142 : vector<1x128xf32>
    %144 = arith.addf %143, %30 : vector<1x128xf32>
    %145 = vector.extract_strided_slice %144 {offsets = [0, 0], sizes = [1, 32], strides = [1, 1]} : vector<1x128xf32> to vector<1x32xf32>
    %146 = vector.extract_strided_slice %144 {offsets = [0, 32], sizes = [1, 32], strides = [1, 1]} : vector<1x128xf32> to vector<1x32xf32>
    %147 = vector.extract_strided_slice %144 {offsets = [0, 64], sizes = [1, 32], strides = [1, 1]} : vector<1x128xf32> to vector<1x32xf32>
    %148 = vector.extract_strided_slice %144 {offsets = [0, 96], sizes = [1, 32], strides = [1, 1]} : vector<1x128xf32> to vector<1x32xf32>
    %149 = arith.mulf %146, %134 : vector<1x32xf32>
    %150 = arith.mulf %145, %148 : vector<1x32xf32>
    %151 = arith.addf %149, %150 : vector<1x32xf32>
    %152 = math.tanh %151 : vector<1x32xf32>
    %153 = arith.mulf %147, %152 : vector<1x32xf32>
    %154 = vector.extract_strided_slice %49 {offsets = [6, 0], sizes = [1, 128], strides = [1, 1]} : vector<8x128xf32> to vector<1x128xf32>
    %155 = arith.truncf %153 : vector<1x32xf32> to vector<1x32xbf16>
    %cst_23 = arith.constant dense<0.000000e+00> : vector<1x128xf32>
    %156 = tpu.matmul %155, %31, %cst_23 {dimension_numbers = #tpu.dot_dimension_numbers<[1], [0], [0], [1], [0, 0, 1, 1], [], []>} : vector<1x32xbf16>, vector<32x128xbf16>, vector<1x128xf32> -> vector<1x128xf32>
    %157 = arith.addf %154, %156 : vector<1x128xf32>
    %158 = arith.mulf %157, %27 : vector<1x128xf32>
    %159 = math.tanh %158 : vector<1x128xf32>
    %160 = arith.mulf %27, %159 : vector<1x128xf32>
    %161 = arith.addf %160, %30 : vector<1x128xf32>
    %162 = vector.extract_strided_slice %161 {offsets = [0, 0], sizes = [1, 32], strides = [1, 1]} : vector<1x128xf32> to vector<1x32xf32>
    %163 = vector.extract_strided_slice %161 {offsets = [0, 32], sizes = [1, 32], strides = [1, 1]} : vector<1x128xf32> to vector<1x32xf32>
    %164 = vector.extract_strided_slice %161 {offsets = [0, 64], sizes = [1, 32], strides = [1, 1]} : vector<1x128xf32> to vector<1x32xf32>
    %165 = vector.extract_strided_slice %161 {offsets = [0, 96], sizes = [1, 32], strides = [1, 1]} : vector<1x128xf32> to vector<1x32xf32>
    %166 = arith.mulf %163, %151 : vector<1x32xf32>
    %167 = arith.mulf %162, %165 : vector<1x32xf32>
    %168 = arith.addf %166, %167 : vector<1x32xf32>
    %169 = math.tanh %168 : vector<1x32xf32>
    %170 = arith.mulf %164, %169 : vector<1x32xf32>
    %171 = vector.extract_strided_slice %49 {offsets = [7, 0], sizes = [1, 128], strides = [1, 1]} : vector<8x128xf32> to vector<1x128xf32>
    %172 = arith.truncf %170 : vector<1x32xf32> to vector<1x32xbf16>
    %cst_24 = arith.constant dense<0.000000e+00> : vector<1x128xf32>
    %173 = tpu.matmul %172, %31, %cst_24 {dimension_numbers = #tpu.dot_dimension_numbers<[1], [0], [0], [1], [0, 0, 1, 1], [], []>} : vector<1x32xbf16>, vector<32x128xbf16>, vector<1x128xf32> -> vector<1x128xf32>
    %174 = arith.addf %171, %173 : vector<1x128xf32>
    %175 = arith.mulf %174, %27 : vector<1x128xf32>
    %176 = math.tanh %175 : vector<1x128xf32>
    %177 = arith.mulf %27, %176 : vector<1x128xf32>
    %178 = arith.addf %177, %30 : vector<1x128xf32>
    %179 = vector.extract_strided_slice %178 {offsets = [0, 0], sizes = [1, 32], strides = [1, 1]} : vector<1x128xf32> to vector<1x32xf32>
    %180 = vector.extract_strided_slice %178 {offsets = [0, 32], sizes = [1, 32], strides = [1, 1]} : vector<1x128xf32> to vector<1x32xf32>
    %181 = vector.extract_strided_slice %178 {offsets = [0, 64], sizes = [1, 32], strides = [1, 1]} : vector<1x128xf32> to vector<1x32xf32>
    %182 = vector.extract_strided_slice %178 {offsets = [0, 96], sizes = [1, 32], strides = [1, 1]} : vector<1x128xf32> to vector<1x32xf32>
    %183 = arith.mulf %180, %168 : vector<1x32xf32>
    %184 = arith.mulf %179, %182 : vector<1x32xf32>
    %185 = arith.addf %183, %184 : vector<1x32xf32>
    %186 = math.tanh %185 : vector<1x32xf32>
    %187 = arith.mulf %181, %186 : vector<1x32xf32>
    %188 = tpu.concatenate %68, %85, %102, %119, %136, %153, %170, %187 in 0 : vector<1x32xf32>, vector<1x32xf32>, vector<1x32xf32>, vector<1x32xf32>, vector<1x32xf32>, vector<1x32xf32>, vector<1x32xf32>, vector<1x32xf32> -> vector<8x32xf32>
    %189 = vector.extract_strided_slice %188 {offsets = [7, 0], sizes = [1, 32], strides = [1, 1]} : vector<8x32xf32> to vector<1x32xf32>
    %190 = vector.extract_strided_slice %188 {offsets = [6, 0], sizes = [1, 32], strides = [1, 1]} : vector<8x32xf32> to vector<1x32xf32>
    %191 = vector.extract_strided_slice %188 {offsets = [5, 0], sizes = [1, 32], strides = [1, 1]} : vector<8x32xf32> to vector<1x32xf32>
    %192 = vector.extract_strided_slice %188 {offsets = [4, 0], sizes = [1, 32], strides = [1, 1]} : vector<8x32xf32> to vector<1x32xf32>
    %193 = vector.extract_strided_slice %188 {offsets = [3, 0], sizes = [1, 32], strides = [1, 1]} : vector<8x32xf32> to vector<1x32xf32>
    %194 = vector.extract_strided_slice %188 {offsets = [2, 0], sizes = [1, 32], strides = [1, 1]} : vector<8x32xf32> to vector<1x32xf32>
    %195 = vector.extract_strided_slice %188 {offsets = [1, 0], sizes = [1, 32], strides = [1, 1]} : vector<8x32xf32> to vector<1x32xf32>
    %196 = vector.extract_strided_slice %188 {offsets = [0, 0], sizes = [1, 32], strides = [1, 1]} : vector<8x32xf32> to vector<1x32xf32>
    %197 = tpu.concatenate %189, %190, %191, %192, %193, %194, %195, %196 in 0 : vector<1x32xf32>, vector<1x32xf32>, vector<1x32xf32>, vector<1x32xf32>, vector<1x32xf32>, vector<1x32xf32>, vector<1x32xf32>, vector<1x32xf32> -> vector<8x32xf32>
    %198 = vector.shape_cast %22 : vector<1x32xi1> to vector<1x32xi1>
    %199 = vector.broadcast %198 : vector<1x32xi1> to vector<8x32xi1>
    %200 = arith.select %199, %188, %197 : vector<8x32xi1>, vector<8x32xf32>
    %c0_25 = arith.constant 0 : index
    %c0_26 = arith.constant 0 : index
    %201 = vector.load %arg5[%c0_25, %c0_26] : memref<32x128xbf16, #tpu.memory_space<vmem>>, vector<32x128xbf16>
    %202 = arith.truncf %200 : vector<8x32xf32> to vector<8x32xbf16>
    %c0_27 = arith.constant 0 : index
    %c0_28 = arith.constant 0 : index
    %203 = vector.load %arg4[%c0_27, %c0_28] : memref<32x128xbf16, #tpu.memory_space<vmem>>, vector<32x128xbf16>
    %cst_29 = arith.constant dense<0.000000e+00> : vector<8x128xf32>
    %204 = tpu.matmul %202, %203, %cst_29 {dimension_numbers = #tpu.dot_dimension_numbers<[1], [0], [0], [1], [0, 0, 1, 1], [], []>} : vector<8x32xbf16>, vector<32x128xbf16>, vector<8x128xf32> -> vector<8x128xf32>
    %c0_30 = arith.constant 0 : index
    %c0_31 = arith.constant 0 : index
    %205 = vector.load %arg6[%c0_30, %c0_31] : memref<1x128xf32, #tpu.memory_space<vmem>>, vector<1x128xf32>
    %206 = vector.broadcast %205 : vector<1x128xf32> to vector<8x128xf32>
    %207 = arith.addf %204, %206 : vector<8x128xf32>
    %208 = vector.extract_strided_slice %207 {offsets = [7, 0], sizes = [1, 128], strides = [1, 1]} : vector<8x128xf32> to vector<1x128xf32>
    %209 = vector.extract_strided_slice %207 {offsets = [6, 0], sizes = [1, 128], strides = [1, 1]} : vector<8x128xf32> to vector<1x128xf32>
    %210 = vector.extract_strided_slice %207 {offsets = [5, 0], sizes = [1, 128], strides = [1, 1]} : vector<8x128xf32> to vector<1x128xf32>
    %211 = vector.extract_strided_slice %207 {offsets = [4, 0], sizes = [1, 128], strides = [1, 1]} : vector<8x128xf32> to vector<1x128xf32>
    %212 = vector.extract_strided_slice %207 {offsets = [3, 0], sizes = [1, 128], strides = [1, 1]} : vector<8x128xf32> to vector<1x128xf32>
    %213 = vector.extract_strided_slice %207 {offsets = [2, 0], sizes = [1, 128], strides = [1, 1]} : vector<8x128xf32> to vector<1x128xf32>
    %214 = vector.extract_strided_slice %207 {offsets = [1, 0], sizes = [1, 128], strides = [1, 1]} : vector<8x128xf32> to vector<1x128xf32>
    %215 = vector.extract_strided_slice %207 {offsets = [0, 0], sizes = [1, 128], strides = [1, 1]} : vector<8x128xf32> to vector<1x128xf32>
    %216 = tpu.concatenate %208, %209, %210, %211, %212, %213, %214, %215 in 0 : vector<1x128xf32>, vector<1x128xf32>, vector<1x128xf32>, vector<1x128xf32>, vector<1x128xf32>, vector<1x128xf32>, vector<1x128xf32>, vector<1x128xf32> -> vector<8x128xf32>
    %217 = vector.shape_cast %19 : vector<1x128xi1> to vector<1x128xi1>
    %218 = vector.broadcast %217 : vector<1x128xi1> to vector<8x128xi1>
    %219 = arith.select %218, %207, %216 : vector<8x128xi1>, vector<8x128xf32>
    %cst_32 = arith.constant 0.000000e+00 : f32
    %220 = vector.broadcast %cst_32 : f32 to vector<1x32xf32>
    %cst_33 = arith.constant 0.000000e+00 : f32
    %221 = vector.broadcast %cst_33 : f32 to vector<1x32xf32>
    %222 = vector.extract_strided_slice %219 {offsets = [0, 0], sizes = [1, 128], strides = [1, 1]} : vector<8x128xf32> to vector<1x128xf32>
    %223 = arith.truncf %220 : vector<1x32xf32> to vector<1x32xbf16>
    %cst_34 = arith.constant dense<0.000000e+00> : vector<1x128xf32>
    %224 = tpu.matmul %223, %201, %cst_34 {dimension_numbers = #tpu.dot_dimension_numbers<[1], [0], [0], [1], [0, 0, 1, 1], [], []>} : vector<1x32xbf16>, vector<32x128xbf16>, vector<1x128xf32> -> vector<1x128xf32>
    %225 = arith.addf %222, %224 : vector<1x128xf32>
    %226 = arith.mulf %225, %27 : vector<1x128xf32>
    %227 = math.tanh %226 : vector<1x128xf32>
    %228 = arith.mulf %27, %227 : vector<1x128xf32>
    %229 = arith.addf %228, %30 : vector<1x128xf32>
    %230 = vector.extract_strided_slice %229 {offsets = [0, 0], sizes = [1, 32], strides = [1, 1]} : vector<1x128xf32> to vector<1x32xf32>
    %231 = vector.extract_strided_slice %229 {offsets = [0, 32], sizes = [1, 32], strides = [1, 1]} : vector<1x128xf32> to vector<1x32xf32>
    %232 = vector.extract_strided_slice %229 {offsets = [0, 64], sizes = [1, 32], strides = [1, 1]} : vector<1x128xf32> to vector<1x32xf32>
    %233 = vector.extract_strided_slice %229 {offsets = [0, 96], sizes = [1, 32], strides = [1, 1]} : vector<1x128xf32> to vector<1x32xf32>
    %234 = arith.mulf %231, %221 : vector<1x32xf32>
    %235 = arith.mulf %230, %233 : vector<1x32xf32>
    %236 = arith.addf %234, %235 : vector<1x32xf32>
    %237 = math.tanh %236 : vector<1x32xf32>
    %238 = arith.mulf %232, %237 : vector<1x32xf32>
    %239 = vector.extract_strided_slice %219 {offsets = [1, 0], sizes = [1, 128], strides = [1, 1]} : vector<8x128xf32> to vector<1x128xf32>
    %240 = arith.truncf %238 : vector<1x32xf32> to vector<1x32xbf16>
    %cst_35 = arith.constant dense<0.000000e+00> : vector<1x128xf32>
    %241 = tpu.matmul %240, %201, %cst_35 {dimension_numbers = #tpu.dot_dimension_numbers<[1], [0], [0], [1], [0, 0, 1, 1], [], []>} : vector<1x32xbf16>, vector<32x128xbf16>, vector<1x128xf32> -> vector<1x128xf32>
    %242 = arith.addf %239, %241 : vector<1x128xf32>
    %243 = arith.mulf %242, %27 : vector<1x128xf32>
    %244 = math.tanh %243 : vector<1x128xf32>
    %245 = arith.mulf %27, %244 : vector<1x128xf32>
    %246 = arith.addf %245, %30 : vector<1x128xf32>
    %247 = vector.extract_strided_slice %246 {offsets = [0, 0], sizes = [1, 32], strides = [1, 1]} : vector<1x128xf32> to vector<1x32xf32>
    %248 = vector.extract_strided_slice %246 {offsets = [0, 32], sizes = [1, 32], strides = [1, 1]} : vector<1x128xf32> to vector<1x32xf32>
    %249 = vector.extract_strided_slice %246 {offsets = [0, 64], sizes = [1, 32], strides = [1, 1]} : vector<1x128xf32> to vector<1x32xf32>
    %250 = vector.extract_strided_slice %246 {offsets = [0, 96], sizes = [1, 32], strides = [1, 1]} : vector<1x128xf32> to vector<1x32xf32>
    %251 = arith.mulf %248, %236 : vector<1x32xf32>
    %252 = arith.mulf %247, %250 : vector<1x32xf32>
    %253 = arith.addf %251, %252 : vector<1x32xf32>
    %254 = math.tanh %253 : vector<1x32xf32>
    %255 = arith.mulf %249, %254 : vector<1x32xf32>
    %256 = vector.extract_strided_slice %219 {offsets = [2, 0], sizes = [1, 128], strides = [1, 1]} : vector<8x128xf32> to vector<1x128xf32>
    %257 = arith.truncf %255 : vector<1x32xf32> to vector<1x32xbf16>
    %cst_36 = arith.constant dense<0.000000e+00> : vector<1x128xf32>
    %258 = tpu.matmul %257, %201, %cst_36 {dimension_numbers = #tpu.dot_dimension_numbers<[1], [0], [0], [1], [0, 0, 1, 1], [], []>} : vector<1x32xbf16>, vector<32x128xbf16>, vector<1x128xf32> -> vector<1x128xf32>
    %259 = arith.addf %256, %258 : vector<1x128xf32>
    %260 = arith.mulf %259, %27 : vector<1x128xf32>
    %261 = math.tanh %260 : vector<1x128xf32>
    %262 = arith.mulf %27, %261 : vector<1x128xf32>
    %263 = arith.addf %262, %30 : vector<1x128xf32>
    %264 = vector.extract_strided_slice %263 {offsets = [0, 0], sizes = [1, 32], strides = [1, 1]} : vector<1x128xf32> to vector<1x32xf32>
    %265 = vector.extract_strided_slice %263 {offsets = [0, 32], sizes = [1, 32], strides = [1, 1]} : vector<1x128xf32> to vector<1x32xf32>
    %266 = vector.extract_strided_slice %263 {offsets = [0, 64], sizes = [1, 32], strides = [1, 1]} : vector<1x128xf32> to vector<1x32xf32>
    %267 = vector.extract_strided_slice %263 {offsets = [0, 96], sizes = [1, 32], strides = [1, 1]} : vector<1x128xf32> to vector<1x32xf32>
    %268 = arith.mulf %265, %253 : vector<1x32xf32>
    %269 = arith.mulf %264, %267 : vector<1x32xf32>
    %270 = arith.addf %268, %269 : vector<1x32xf32>
    %271 = math.tanh %270 : vector<1x32xf32>
    %272 = arith.mulf %266, %271 : vector<1x32xf32>
    %273 = vector.extract_strided_slice %219 {offsets = [3, 0], sizes = [1, 128], strides = [1, 1]} : vector<8x128xf32> to vector<1x128xf32>
    %274 = arith.truncf %272 : vector<1x32xf32> to vector<1x32xbf16>
    %cst_37 = arith.constant dense<0.000000e+00> : vector<1x128xf32>
    %275 = tpu.matmul %274, %201, %cst_37 {dimension_numbers = #tpu.dot_dimension_numbers<[1], [0], [0], [1], [0, 0, 1, 1], [], []>} : vector<1x32xbf16>, vector<32x128xbf16>, vector<1x128xf32> -> vector<1x128xf32>
    %276 = arith.addf %273, %275 : vector<1x128xf32>
    %277 = arith.mulf %276, %27 : vector<1x128xf32>
    %278 = math.tanh %277 : vector<1x128xf32>
    %279 = arith.mulf %27, %278 : vector<1x128xf32>
    %280 = arith.addf %279, %30 : vector<1x128xf32>
    %281 = vector.extract_strided_slice %280 {offsets = [0, 0], sizes = [1, 32], strides = [1, 1]} : vector<1x128xf32> to vector<1x32xf32>
    %282 = vector.extract_strided_slice %280 {offsets = [0, 32], sizes = [1, 32], strides = [1, 1]} : vector<1x128xf32> to vector<1x32xf32>
    %283 = vector.extract_strided_slice %280 {offsets = [0, 64], sizes = [1, 32], strides = [1, 1]} : vector<1x128xf32> to vector<1x32xf32>
    %284 = vector.extract_strided_slice %280 {offsets = [0, 96], sizes = [1, 32], strides = [1, 1]} : vector<1x128xf32> to vector<1x32xf32>
    %285 = arith.mulf %282, %270 : vector<1x32xf32>
    %286 = arith.mulf %281, %284 : vector<1x32xf32>
    %287 = arith.addf %285, %286 : vector<1x32xf32>
    %288 = math.tanh %287 : vector<1x32xf32>
    %289 = arith.mulf %283, %288 : vector<1x32xf32>
    %290 = vector.extract_strided_slice %219 {offsets = [4, 0], sizes = [1, 128], strides = [1, 1]} : vector<8x128xf32> to vector<1x128xf32>
    %291 = arith.truncf %289 : vector<1x32xf32> to vector<1x32xbf16>
    %cst_38 = arith.constant dense<0.000000e+00> : vector<1x128xf32>
    %292 = tpu.matmul %291, %201, %cst_38 {dimension_numbers = #tpu.dot_dimension_numbers<[1], [0], [0], [1], [0, 0, 1, 1], [], []>} : vector<1x32xbf16>, vector<32x128xbf16>, vector<1x128xf32> -> vector<1x128xf32>
    %293 = arith.addf %290, %292 : vector<1x128xf32>
    %294 = arith.mulf %293, %27 : vector<1x128xf32>
    %295 = math.tanh %294 : vector<1x128xf32>
    %296 = arith.mulf %27, %295 : vector<1x128xf32>
    %297 = arith.addf %296, %30 : vector<1x128xf32>
    %298 = vector.extract_strided_slice %297 {offsets = [0, 0], sizes = [1, 32], strides = [1, 1]} : vector<1x128xf32> to vector<1x32xf32>
    %299 = vector.extract_strided_slice %297 {offsets = [0, 32], sizes = [1, 32], strides = [1, 1]} : vector<1x128xf32> to vector<1x32xf32>
    %300 = vector.extract_strided_slice %297 {offsets = [0, 64], sizes = [1, 32], strides = [1, 1]} : vector<1x128xf32> to vector<1x32xf32>
    %301 = vector.extract_strided_slice %297 {offsets = [0, 96], sizes = [1, 32], strides = [1, 1]} : vector<1x128xf32> to vector<1x32xf32>
    %302 = arith.mulf %299, %287 : vector<1x32xf32>
    %303 = arith.mulf %298, %301 : vector<1x32xf32>
    %304 = arith.addf %302, %303 : vector<1x32xf32>
    %305 = math.tanh %304 : vector<1x32xf32>
    %306 = arith.mulf %300, %305 : vector<1x32xf32>
    %307 = vector.extract_strided_slice %219 {offsets = [5, 0], sizes = [1, 128], strides = [1, 1]} : vector<8x128xf32> to vector<1x128xf32>
    %308 = arith.truncf %306 : vector<1x32xf32> to vector<1x32xbf16>
    %cst_39 = arith.constant dense<0.000000e+00> : vector<1x128xf32>
    %309 = tpu.matmul %308, %201, %cst_39 {dimension_numbers = #tpu.dot_dimension_numbers<[1], [0], [0], [1], [0, 0, 1, 1], [], []>} : vector<1x32xbf16>, vector<32x128xbf16>, vector<1x128xf32> -> vector<1x128xf32>
    %310 = arith.addf %307, %309 : vector<1x128xf32>
    %311 = arith.mulf %310, %27 : vector<1x128xf32>
    %312 = math.tanh %311 : vector<1x128xf32>
    %313 = arith.mulf %27, %312 : vector<1x128xf32>
    %314 = arith.addf %313, %30 : vector<1x128xf32>
    %315 = vector.extract_strided_slice %314 {offsets = [0, 0], sizes = [1, 32], strides = [1, 1]} : vector<1x128xf32> to vector<1x32xf32>
    %316 = vector.extract_strided_slice %314 {offsets = [0, 32], sizes = [1, 32], strides = [1, 1]} : vector<1x128xf32> to vector<1x32xf32>
    %317 = vector.extract_strided_slice %314 {offsets = [0, 64], sizes = [1, 32], strides = [1, 1]} : vector<1x128xf32> to vector<1x32xf32>
    %318 = vector.extract_strided_slice %314 {offsets = [0, 96], sizes = [1, 32], strides = [1, 1]} : vector<1x128xf32> to vector<1x32xf32>
    %319 = arith.mulf %316, %304 : vector<1x32xf32>
    %320 = arith.mulf %315, %318 : vector<1x32xf32>
    %321 = arith.addf %319, %320 : vector<1x32xf32>
    %322 = math.tanh %321 : vector<1x32xf32>
    %323 = arith.mulf %317, %322 : vector<1x32xf32>
    %324 = vector.extract_strided_slice %219 {offsets = [6, 0], sizes = [1, 128], strides = [1, 1]} : vector<8x128xf32> to vector<1x128xf32>
    %325 = arith.truncf %323 : vector<1x32xf32> to vector<1x32xbf16>
    %cst_40 = arith.constant dense<0.000000e+00> : vector<1x128xf32>
    %326 = tpu.matmul %325, %201, %cst_40 {dimension_numbers = #tpu.dot_dimension_numbers<[1], [0], [0], [1], [0, 0, 1, 1], [], []>} : vector<1x32xbf16>, vector<32x128xbf16>, vector<1x128xf32> -> vector<1x128xf32>
    %327 = arith.addf %324, %326 : vector<1x128xf32>
    %328 = arith.mulf %327, %27 : vector<1x128xf32>
    %329 = math.tanh %328 : vector<1x128xf32>
    %330 = arith.mulf %27, %329 : vector<1x128xf32>
    %331 = arith.addf %330, %30 : vector<1x128xf32>
    %332 = vector.extract_strided_slice %331 {offsets = [0, 0], sizes = [1, 32], strides = [1, 1]} : vector<1x128xf32> to vector<1x32xf32>
    %333 = vector.extract_strided_slice %331 {offsets = [0, 32], sizes = [1, 32], strides = [1, 1]} : vector<1x128xf32> to vector<1x32xf32>
    %334 = vector.extract_strided_slice %331 {offsets = [0, 64], sizes = [1, 32], strides = [1, 1]} : vector<1x128xf32> to vector<1x32xf32>
    %335 = vector.extract_strided_slice %331 {offsets = [0, 96], sizes = [1, 32], strides = [1, 1]} : vector<1x128xf32> to vector<1x32xf32>
    %336 = arith.mulf %333, %321 : vector<1x32xf32>
    %337 = arith.mulf %332, %335 : vector<1x32xf32>
    %338 = arith.addf %336, %337 : vector<1x32xf32>
    %339 = math.tanh %338 : vector<1x32xf32>
    %340 = arith.mulf %334, %339 : vector<1x32xf32>
    %341 = vector.extract_strided_slice %219 {offsets = [7, 0], sizes = [1, 128], strides = [1, 1]} : vector<8x128xf32> to vector<1x128xf32>
    %342 = arith.truncf %340 : vector<1x32xf32> to vector<1x32xbf16>
    %cst_41 = arith.constant dense<0.000000e+00> : vector<1x128xf32>
    %343 = tpu.matmul %342, %201, %cst_41 {dimension_numbers = #tpu.dot_dimension_numbers<[1], [0], [0], [1], [0, 0, 1, 1], [], []>} : vector<1x32xbf16>, vector<32x128xbf16>, vector<1x128xf32> -> vector<1x128xf32>
    %344 = arith.addf %341, %343 : vector<1x128xf32>
    %345 = arith.mulf %344, %27 : vector<1x128xf32>
    %346 = math.tanh %345 : vector<1x128xf32>
    %347 = arith.mulf %27, %346 : vector<1x128xf32>
    %348 = arith.addf %347, %30 : vector<1x128xf32>
    %349 = vector.extract_strided_slice %348 {offsets = [0, 0], sizes = [1, 32], strides = [1, 1]} : vector<1x128xf32> to vector<1x32xf32>
    %350 = vector.extract_strided_slice %348 {offsets = [0, 32], sizes = [1, 32], strides = [1, 1]} : vector<1x128xf32> to vector<1x32xf32>
    %351 = vector.extract_strided_slice %348 {offsets = [0, 64], sizes = [1, 32], strides = [1, 1]} : vector<1x128xf32> to vector<1x32xf32>
    %352 = vector.extract_strided_slice %348 {offsets = [0, 96], sizes = [1, 32], strides = [1, 1]} : vector<1x128xf32> to vector<1x32xf32>
    %353 = arith.mulf %350, %338 : vector<1x32xf32>
    %354 = arith.mulf %349, %352 : vector<1x32xf32>
    %355 = arith.addf %353, %354 : vector<1x32xf32>
    %356 = math.tanh %355 : vector<1x32xf32>
    %357 = arith.mulf %351, %356 : vector<1x32xf32>
    %358 = tpu.concatenate %238, %255, %272, %289, %306, %323, %340, %357 in 0 : vector<1x32xf32>, vector<1x32xf32>, vector<1x32xf32>, vector<1x32xf32>, vector<1x32xf32>, vector<1x32xf32>, vector<1x32xf32>, vector<1x32xf32> -> vector<8x32xf32>
    %359 = vector.extract_strided_slice %358 {offsets = [7, 0], sizes = [1, 32], strides = [1, 1]} : vector<8x32xf32> to vector<1x32xf32>
    %360 = vector.extract_strided_slice %358 {offsets = [6, 0], sizes = [1, 32], strides = [1, 1]} : vector<8x32xf32> to vector<1x32xf32>
    %361 = vector.extract_strided_slice %358 {offsets = [5, 0], sizes = [1, 32], strides = [1, 1]} : vector<8x32xf32> to vector<1x32xf32>
    %362 = vector.extract_strided_slice %358 {offsets = [4, 0], sizes = [1, 32], strides = [1, 1]} : vector<8x32xf32> to vector<1x32xf32>
    %363 = vector.extract_strided_slice %358 {offsets = [3, 0], sizes = [1, 32], strides = [1, 1]} : vector<8x32xf32> to vector<1x32xf32>
    %364 = vector.extract_strided_slice %358 {offsets = [2, 0], sizes = [1, 32], strides = [1, 1]} : vector<8x32xf32> to vector<1x32xf32>
    %365 = vector.extract_strided_slice %358 {offsets = [1, 0], sizes = [1, 32], strides = [1, 1]} : vector<8x32xf32> to vector<1x32xf32>
    %366 = vector.extract_strided_slice %358 {offsets = [0, 0], sizes = [1, 32], strides = [1, 1]} : vector<8x32xf32> to vector<1x32xf32>
    %367 = tpu.concatenate %359, %360, %361, %362, %363, %364, %365, %366 in 0 : vector<1x32xf32>, vector<1x32xf32>, vector<1x32xf32>, vector<1x32xf32>, vector<1x32xf32>, vector<1x32xf32>, vector<1x32xf32>, vector<1x32xf32> -> vector<8x32xf32>
    %368 = vector.shape_cast %22 : vector<1x32xi1> to vector<1x32xi1>
    %369 = vector.broadcast %368 : vector<1x32xi1> to vector<8x32xi1>
    %370 = arith.select %369, %358, %367 : vector<8x32xi1>, vector<8x32xf32>
    %371 = arith.truncf %370 : vector<8x32xf32> to vector<8x32xbf16>
    %c0_42 = arith.constant 0 : index
    %c0_43 = arith.constant 0 : index
    %372 = vector.load %arg7[%c0_42, %c0_43] : memref<32x32xbf16, #tpu.memory_space<vmem>>, vector<32x32xbf16>
    %cst_44 = arith.constant dense<0.000000e+00> : vector<8x32xf32>
    %373 = tpu.matmul %371, %372, %cst_44 {dimension_numbers = #tpu.dot_dimension_numbers<[1], [0], [0], [1], [0, 0, 1, 1], [], []>} : vector<8x32xbf16>, vector<32x32xbf16>, vector<8x32xf32> -> vector<8x32xf32>
    %c0_45 = arith.constant 0 : index
    %c0_46 = arith.constant 0 : index
    %374 = vector.load %arg8[%c0_45, %c0_46] : memref<1x32xf32, #tpu.memory_space<vmem>>, vector<1x32xf32>
    %375 = vector.broadcast %374 : vector<1x32xf32> to vector<8x32xf32>
    %376 = arith.addf %373, %375 : vector<8x32xf32>
    %377 = arith.addf %376, %0 : vector<8x32xf32>
    %c0_47 = arith.constant 0 : index
    %c0_48 = arith.constant 0 : index
    %378 = vector.load %arg9[%c0_47, %c0_48] : memref<8x32xf32, #tpu.memory_space<vmem>>, vector<8x32xf32>
    tpu.vector_store %arg9[%c0_47, %c0_48], %377 {strides = array<i32>} : memref<8x32xf32, #tpu.memory_space<vmem>>, vector<8x32xf32>,
    return
  }
}

</mosaic_0001>

<bundles_post_ra>
// kernel: forward.1
= control target key start
LH: loop header
LB: loop body
LE: loop exit
PB: predicated region body
PF: predicated region fallthrough
CT: control target
= control target key end

     0   :  { %14 = vsyncpa [#allocation3], 0  ;;  %s2658_s0 = inlined_call_operand.hbm [shape: f32[8,32], index: 0, kind: input, shape index: {}]   ;;  %s2659_s1 = inlined_call_operand.hbm [shape: bf16[32,128], index: 1, kind: input, shape index: {}]   ;;  %s2660_s2 = inlined_call_operand.hbm [shape: bf16[32,128], index: 2, kind: input, shape index: {}]   ;;  %s2661_s3 = inlined_call_operand.hbm [shape: f32[1,128], index: 3, kind: input, shape index: {}]   ;;  %s2662_s4 = inlined_call_operand.hbm [shape: bf16[32,128], index: 4, kind: input, shape index: {}]   ;;  %s2663_s5 = inlined_call_operand.vmem [shape: bf16[32,128], index: 5, kind: input, shape index: {}]   ;;  %s2664_s6 = inlined_call_operand.vmem [shape: f32[1,128], index: 6, kind: input, shape index: {}]   ;;  %s2665_s7 = inlined_call_operand.vmem [shape: bf16[32,32], index: 7, kind: input, shape index: {}]   ;;  %s2666_s8 = inlined_call_operand.vmem [shape: f32[1,32], index: 8, kind: input, shape index: {}]   ;;  %s2667_s9 = inlined_call_operand.hbm [shape: f32[8,32], index: 9, kind: output, shape index: {}]  }
   0x1   :  { %15 = vsyncpa [#allocation6], 0 }
   0x2   :  { %16 = vsyncpa [#allocation9], 0 }
   0x3   :  { %17 = vsyncpa [#allocation4], 0  ;;  %s2154_s30 = smov [#allocation5]   ;;  %s2014_s13 = scalar_lea.hbm %s2659_s1, 256 }
   0x4   :  { %s33_s10 = sshll.u32 %s2154_s30, 4  ;;  %p2015_p0 = scmp.ne.s32.totalorder %s2659_s1, %s2014_s13  ;;  %s34_s10 = int_to_ptr.vmem [resolvable:$true] %s33_s10 }
   0x5   :  { %p2018_p1 = scmp.lt.u32.totalorder %s2014_s13, %s2659_s1 }
   0x7   :  { %p2020_p2 = pnand %p2018_p1, %p2015_p0 }
   0x9   :  { %2023 = shalt.err (!%p2020_p2)
}
   0xa   :  { %s2024_s18 = scalar_lea.vmem %s34_s10, 256  ;;  %p2029_p4 = scmp.lt.s32.totalorder %s34_s10, %s34_s10 }
   0xb   :  { %p2025_p3 = scmp.ne.s32.totalorder %s34_s10, %s2024_s18  ;;  %p2030_p5 = scmp.lt.s32.totalorder %s2024_s18, %s2024_s18 }
   0xd   :  { %p2031_p6 = por %p2030_p5, %p2029_p4 }
   0xf   :  { %p2032_p7 = pnand %p2031_p6, %p2025_p3 }
  0x11   :  { %2035 = shalt.err (!%p2032_p7)
}
  0x12   :  { %s2155_s19 = smov 64   ;;  %s2156_s20 = smov 4  }
  0x13   :  { %39 = dma.hbm_to_vmem [thread:$0]  %s2659_s1, 256, %s34_s10, [#allocation6], %s2155_s19, %s2155_s19, %s2156_s20  }
  0x14   :  { %s2157_s23 = smov [#allocation8]   ;;  %s2158_s25 = smov [#allocation2]  }
  0x15   :  { %s58_s24 = sshll.u32 %s2157_s23, 4  ;;  %s24_s26 = sshll.u32 %s2158_s25, 4  ;;  %s59_s24 = int_to_ptr.vmem [resolvable:$true] %s58_s24  ;;  %s25_s26 = int_to_ptr.vmem [resolvable:$true] %s24_s26 }
  0x16   :  { %s2036_s29 = scalar_lea.hbm %s2661_s3, 16 }
  0x17   :  { %p2037_p8 = scmp.ne.s32.totalorder %s2661_s3, %s2036_s29  ;;  %p2040_p9 = scmp.lt.u32.totalorder %s2036_s29, %s2661_s3 }
  0x19   :  { %p2042_p10 = pnand %p2040_p9, %p2037_p8 }
  0x1b   :  { %2045 = shalt.err (!%p2042_p10)
}
  0x1c   :  { %s2046_s1 = scalar_lea.vmem %s59_s24, 16  ;;  %s2050_s10 = scalar_lea.vmem %s59_s24, 32 }
  0x1d   :  { %p2047_p11 = scmp.ne.s32.totalorder %s59_s24, %s2046_s1  ;;  %p2051_p12 = scmp.lt.s32.totalorder %s59_s24, %s59_s24 }
  0x1e   :  { %p2052_p13 = scmp.lt.s32.totalorder %s2050_s10, %s2046_s1 }
  0x20   :  { %p2053_p0 = por %p2052_p13, %p2051_p12 }
  0x22   :  { %p2054_p1 = pnand %p2053_p0, %p2047_p11 }
  0x24   :  { %2057 = shalt.err (!%p2054_p1)
}
  0x25   :  { %61 = dma.hbm_to_vmem [thread:$0]  %s2661_s3, 16, %s59_s24, [#allocation9]  }
  0x26   :  { %s2058_s18 = scalar_lea.hbm %s2658_s0, 128 }
  0x27   :  { %p2059_p2 = scmp.ne.s32.totalorder %s2658_s0, %s2058_s18  ;;  %p2062_p3 = scmp.lt.u32.totalorder %s2058_s18, %s2658_s0 }
  0x29   :  { %p2064_p4 = pnand %p2062_p3, %p2059_p2 }
  0x2b   :  { %2067 = shalt.err (!%p2064_p4)
}
  0x2c   :  { %s2068_s27 = scalar_lea.vmem %s25_s26, 128  ;;  %p2073_p6 = scmp.lt.s32.totalorder %s25_s26, %s25_s26 }
  0x2d   :  { %p2069_p5 = scmp.ne.s32.totalorder %s25_s26, %s2068_s27  ;;  %p2074_p7 = scmp.lt.s32.totalorder %s2068_s27, %s2068_s27 }
  0x2f   :  { %p2075_p8 = por %p2074_p7, %p2073_p6 }
  0x31   :  { %p2076_p9 = pnand %p2075_p8, %p2069_p5 }
  0x33   :  { %2079 = shalt.err (!%p2076_p9)
}
  0x34   :  { %27 = dma.hbm_to_vmem [thread:$0]  %s2658_s0, 128, %s25_s26, [#allocation3]  }
  0x35   :  { %s2159_s28 = smov [#allocation7]   ;;  %s2160_s30 = smov [#allocation10]  }
  0x36   :  { %s45_s29 = sshll.u32 %s2159_s28, 4  ;;  %s67_s11 = sshll.u32 %s2160_s30, 4  ;;  %s46_s29 = int_to_ptr.vmem [resolvable:$true] %s45_s29  ;;  %s68_s11 = int_to_ptr.vmem [resolvable:$true] %s67_s11 }
  0x37   :  { %s2080_s1 = scalar_lea.hbm %s2660_s2, 256 }
  0x38   :  { %p2081_p10 = scmp.ne.s32.totalorder %s2660_s2, %s2080_s1  ;;  %p2084_p11 = scmp.lt.u32.totalorder %s2080_s1, %s2660_s2 }
  0x3a   :  { %p2086_p12 = pnand %p2084_p11, %p2081_p10 }
  0x3c   :  { %2089 = shalt.err (!%p2086_p12)
}
  0x3d   :  { %s2090_s0 = scalar_lea.vmem %s46_s29, 256  ;;  %p2095_p0 = scmp.lt.s32.totalorder %s46_s29, %s46_s29 }
  0x3e   :  { %p2091_p13 = scmp.ne.s32.totalorder %s46_s29, %s2090_s0  ;;  %p2096_p1 = scmp.lt.s32.totalorder %s2090_s0, %s2090_s0 }
  0x40   :  { %p2097_p2 = por %p2096_p1, %p2095_p0 }
  0x42   :  { %p2098_p3 = pnand %p2097_p2, %p2091_p13 }
  0x44   :  { %2101 = shalt.err (!%p2098_p3)
}
  0x45   :  { %51 = dma.hbm_to_vmem [thread:$0]  %s2660_s2, 256, %s46_s29, [#allocation6], %s2155_s19, %s2155_s19, %s2156_s20  }
  0x46   :  { %s2102_s22 = scalar_lea.hbm %s2662_s4, 256 }
  0x47   :  { %p2103_p4 = scmp.ne.s32.totalorder %s2662_s4, %s2102_s22  ;;  %p2106_p5 = scmp.lt.u32.totalorder %s2102_s22, %s2662_s4 }
  0x49   :  { %p2108_p6 = pnand %p2106_p5, %p2103_p4 }
  0x4b   :  { %2111 = shalt.err (!%p2108_p6)
}
  0x4c   :  { %s2112_s24 = scalar_lea.vmem %s68_s11, 256  ;;  %p2117_p8 = scmp.lt.s32.totalorder %s68_s11, %s68_s11 }
  0x4d   :  { %p2113_p7 = scmp.ne.s32.totalorder %s68_s11, %s2112_s24  ;;  %p2118_p9 = scmp.lt.s32.totalorder %s2112_s24, %s2112_s24 }
  0x4f   :  { %p2119_p10 = por %p2118_p9, %p2117_p8 }
  0x51   :  { %p2120_p11 = pnand %p2119_p10, %p2113_p7 }
  0x53   :  { %2123 = shalt.err (!%p2120_p11)
}
  0x54   :  { %73 = dma.hbm_to_vmem [thread:$0]  %s2662_s4, 256, %s68_s11, [#allocation9], %s2155_s19, %s2155_s19, %s2156_s20  }
  0x55   :  { %2146 = dma.done.wait [#allocation3], 128  }
  0x56   :  { %2147 = vsyncadd [#allocation3], 4294967168 }
  0x57   :  { %2148 = dma.done.wait [#allocation6], 512  }
  0x58   :  { %2149 = vsyncadd [#allocation6], 4294966784 }
  0x59   :  { %2150 = dma.done.wait [#allocation9], 272  }
  0x5a   :  { %2151 = vsyncadd [#allocation9], 4294967024  ;;  %v2161_v0 = vmov 0.0   ;;  %vm2162_vm0 = vmmov 0   ;;  %v1939_v1 = vld [vmem:[#allocation5] sm:$0xff]   ;;  %v1940_v2 = vld [vmem:[#allocation5 + $0x8] sm:$0xff]   ;;  %v99_v8 = vlaneseq }
  0x5b   :  { %1764 = vmatprep.subr.bf16.mxu0 %v2161_v0  ;;  %1768 = vmatprep.mubr.msk.bf16.mxu0 %vm2162_vm0, %v2161_v0  ;;  %v98_v3 = vld [vmem:[#allocation2] sm:$0xff]  ;;  %v2293_v4 = vld [vmem:[#allocation7] sm:$0xff]   ;;  %vm146_vm1 = vcmask 261120   ;;  %v2163_v7 = vmov 0   ;;  %v1677_v9 = vld [vmem:[#allocation8] ss:$0 sm:$0xff] }
  0x5c   :  { %1772 = vmatprep.subr.bf16.mxu1 %v2161_v0  ;;  %1776 = vmatprep.mubr.msk.bf16.mxu1 %vm2162_vm0, %v2161_v0  ;;  %v2295_v5 = vld [vmem:[#allocation7 + $0x8] sm:$0xff]   ;;  %v122_v6 = vpack.c.bf16 %v98_v3, %v98_v3  ;;  %v2316_v11 = vand.u32 127, %v99_v8  ;;  %vm199_vm2 = vcmask 1040384   ;;  %vm201_vm3 = vcmask 1041408   ;;  %s2165_s4 = smov 32   ;;  %s2166_s15 = smov [#allocation11]  }
  0x5d   :  { %1765 = vmatpush3.bf16.msra.mxu0 %v1939_v1  ;;  %1773 = vmatpush3.bf16.msra.mxu1 %v2293_v4  ;;  %vm203_vm4 = vcmask 1042432   ;;  %vm205_vm5 = vcmask 1043456   ;;  %vm207_vm6 = vcmask 1044480   ;;  %vm209_vm7 = vcmask 1045504   ;;  %s1666_s16 = sshll.u32 %s2166_s15, 4  ;;  %s1667_s16 = int_to_ptr.vmem [resolvable:$true] %s1666_s16 }
  0x5e   :  { %1766 = vmatprep.subr.bf16.mxu0 %v2161_v0  ;;  %1774 = vmatprep.subr.bf16.mxu1 %v2161_v0  ;;  %v105_v21 = vand.u32 31, %v2316_v11  ;;  %vm211_vm8 = vcmask 1046528   ;;  %vm115_vm10 = vcmp.lt.s32.totalorder %v2316_v11, 96  ;;  %v2164_v33 = vmov 1.0   ;;  %p2129_p13 = scmp.lt.s32.totalorder %s1667_s16, %s1667_s16 }
  0x5f   :  { %v2331_v34 = vsel %vm115_vm10, 0.5, %v2164_v33  ;;  %v2340_v39 = vsel %vm115_vm10, 0.5, %v2161_v0  ;;  %vm114_vm11 = vcmp.lt.s32.totalorder %v2316_v11, 16 }
  0x60   :  { %vm2323_vm9 = vcmp.lt.s32.totalorder %v105_v21, 16 }
  0x61   :  { %1767 = vmatpush3.bf16.msra.mxu0 %v1940_v2  ;;  %1775 = vmatpush3.bf16.msra.mxu1 %v2295_v5 }
  0x62   :  { %1780 = vmatprep.subr.bf16.mxu0 %v2161_v0  ;;  %1788 = vmatprep.subr.bf16.mxu1 %v2161_v0 }
  0x64   :  { %1769 = vmatmul.mubr.msk.bf16.vlgmr.msra.gmra.mrb[0].mxu0 %vm146_vm1, %v122_v6  ;;  %1777 = vmatmul.mubr.bf16.vlgmr.msra.gmra.mrb[0].mxu1 %v2163_v7 }
  0x65   :  { %1781 = vmatpush3.bf16.msra.mxu0 %v2293_v4  ;;  %1784 = vmatprep.mubr.msk.bf16.mxu0 %vm2162_vm0, %v2161_v0 }
  0x66   :  { %1782 = vmatprep.subr.bf16.mxu0 %v2161_v0  ;;  %1789 = vmatpush3.bf16.msra.mxu1 %v2293_v4 }
  0x67   :  { %1792 = vmatprep.mubr.msk.bf16.mxu1 %vm2162_vm0, %v2161_v0  ;;  %1790 = vmatprep.subr.bf16.mxu1 %v2161_v0 }
  0x69   :  { %1783 = vmatpush3.bf16.msra.mxu0 %v2295_v5 }
  0x6a   :  { %1796 = vmatprep.subr.bf16.mxu0 %v2161_v0  ;;  %1791 = vmatpush3.bf16.msra.mxu1 %v2295_v5 }
  0x6b   :  { %1804 = vmatprep.subr.bf16.mxu1 %v2161_v0 }
 0x137   :  { %v184_v10 = vpop.f32.mrb[0].mxu0  ;;  %v265_v19 = vpop.f32.mrb[0].mxu1 }
 0x138   :  { %v185_v12 = vadd.f32 %v1677_v9, %v184_v10  ;;  %v1770_v13 = vpop.f32.mrb[1].mxu0  ;;  %v1778_v20 = vpop.f32.mrb[1].mxu1 }
 0x139   :  { %v187_v14 = vpop.f32.mrb[2].mxu0  ;;  %v268_v24 = vpop.f32.mrb[2].mxu1 }
 0x13a   :  { %v191_v15 = vrot.slane %v185_v12, 7  ;;  %v193_v16 = vrot.slane %v185_v12, 5  ;;  %v195_v17 = vrot.slane %v185_v12, 3  ;;  %v1771_v18 = vpop.f32.mrb[3].mxu0  ;;  %v197_v22 = vrot.slane %v185_v12, 1  ;;  %v1779_v26 = vpop.f32.mrb[3].mxu1 }
 0x13c   :  { %v200_v23 = vsel %vm199_vm2, %v191_v15, %v193_v16 }
 0x13d   :  { %v202_v25 = vsel %vm201_vm3, %v200_v23, %v195_v17 }
 0x13e   :  { %v204_v27 = vsel %vm203_vm4, %v202_v25, %v197_v22 }
 0x13f   :  { %v206_v28 = vsel %vm205_vm5, %v204_v27, %v191_v15 }
 0x140   :  { %v208_v30 = vsel %vm207_vm6, %v206_v28, %v193_v16 }
 0x141   :  { %v210_v31 = vsel %vm209_vm7, %v208_v30, %v195_v17 }
 0x142   :  { %v212_v32 = vsel %vm211_vm8, %v210_v31, %v197_v22 }
 0x143   :  { %v2335_v35 = vsel %vm2323_vm9, %v185_v12, %v212_v32 }
 0x144   :  { %v271_v36 = vadd.f32 %v265_v19, %v2335_v35 }
 0x146   :  { %v272_v37 = vmul.f32 %v271_v36, %v2331_v34 }
 0x148   :  { %1949 = vtanh.f32 %v272_v37 }
 0x152   :  { %v1950_v38 = vpop.eup %1949 }
 0x153   :  { %v274_v40 = vmul.f32 %v1950_v38, %v2331_v34 }
 0x155   :  { %v275_v41 = vadd.f32 %v274_v40, %v2340_v39 }
 0x157   :  { %278 = vrot.lane.b32.xlu0 %v275_v41, %s2165_s4  ;;  %v276_v44 = vmul.f32 0.0, %v275_v41 }
 0x1c9   :  { %v279_v42 = vpop.permute.xlu0 %278 }
 0x1ca   :  { %v281_v43 = vmul.f32 %v279_v42, %v275_v41 }
 0x1cc   :  { %283 = vrot.lane.b32.xlu0 %v281_v43, %s2165_s4 }
 0x23e   :  { %v284_v45 = vpop.permute.xlu0 %283 }
 0x23f   :  { %v286_v46 = vadd.f32 %v284_v45, %v276_v44 }
 0x241   :  { %1951 = vtanh.f32 %v286_v46  ;;  %v349_v1 = vrot.slane %v286_v46, 7 }
 0x24b   :  { %v1952_v47 = vpop.eup %1951 }
 0x24c   :  { %289 = vrot.lane.b32.xlu1 %v1952_v47, %s2165_s4 }
 0x2be   :  { %v290_v48 = vpop.permute.xlu1 %289 }
 0x2bf   :  { %v2347_v49 = vmul.f32 %v290_v48, %v275_v41 }
 0x2c1   :  { %v293_v50 = vpack.c.bf16 %v2347_v49, %v2347_v49 }
 0x2c3   :  { %295 = vrot.lane.b32.xlu1 %v293_v50, %s2155_s19 }
 0x335   :  { %v296_v51 = vpop.permute.xlu1 %295 }
 0x336   :  { %1785 = vmatmul.mubr.msk.bf16.vlgmr.msra.gmra.mrb[4].mxu0 %vm146_vm1, %v296_v51 }
 0x337   :  { %1797 = vmatpush3.bf16.msra.mxu0 %v2293_v4  ;;  %1800 = vmatprep.mubr.msk.bf16.mxu0 %vm2162_vm0, %v2161_v0 }
 0x338   :  { %1798 = vmatprep.subr.bf16.mxu0 %v2161_v0 }
 0x33b   :  { %1799 = vmatpush3.bf16.msra.mxu0 %v2295_v5 }
 0x33c   :  { %1812 = vmatprep.subr.bf16.mxu0 %v2161_v0 }
 0x409   :  { %v334_v52 = vpop.f32.mrb[4].mxu0 }
 0x40a   :  { %v341_v53 = vrot.slane %v334_v52, 7  ;;  %v1786_v54 = vpop.f32.mrb[5].mxu0 }
 0x40b   :  { %v337_v55 = vpop.f32.mrb[6].mxu0 }
 0x40c   :  { %v343_v56 = vadd.f32 %v341_v53, %v2335_v35  ;;  %v1787_v57 = vpop.f32.mrb[7].mxu0 }
 0x40e   :  { %v344_v58 = vmul.f32 %v343_v56, %v2331_v34 }
 0x410   :  { %1953 = vtanh.f32 %v344_v58 }
 0x41a   :  { %v1954_v59 = vpop.eup %1953 }
 0x41b   :  { %v346_v60 = vmul.f32 %v1954_v59, %v2331_v34 }
 0x41d   :  { %v347_v61 = vadd.f32 %v346_v60, %v2340_v39 }
 0x41f   :  { %353 = vrot.lane.b32.xlu0 %v347_v61, %s2165_s4  ;;  %v351_v2 = vmul.f32 %v349_v1, %v347_v61 }
 0x491   :  { %v354_v62 = vpop.permute.xlu0 %353 }
 0x492   :  { %v356_v63 = vmul.f32 %v354_v62, %v347_v61 }
 0x494   :  { %358 = vrot.lane.b32.xlu1 %v356_v63, %s2165_s4 }
 0x506   :  { %v359_v3 = vpop.permute.xlu1 %358 }
 0x507   :  { %v361_v6 = vadd.f32 %v359_v3, %v351_v2 }
 0x509   :  { %1955 = vtanh.f32 %v361_v6  ;;  %v426_v27 = vrot.slane %v361_v6, 7 }
 0x513   :  { %v1956_v8 = vpop.eup %1955 }
 0x514   :  { %364 = vrot.lane.b32.xlu0 %v1956_v8, %s2165_s4 }
 0x586   :  { %v365_v9 = vpop.permute.xlu0 %364 }
 0x587   :  { %v367_v10 = vmul.f32 %v365_v9, %v347_v61 }
 0x589   :  { %v368_v12 = vpack.c.bf16 %v367_v10, %v367_v10  ;;  %v829_v37 = vsel %vm199_vm2, %v2347_v49, %v367_v10 }
 0x58b   :  { %v370_v13 = vshrl.u32 %v368_v12, 16 }
 0x58d   :  { %372 = vrot.lane.b32.xlu1 %v370_v13, %s2155_s19 }
 0x5ff   :  { %v373_v14 = vpop.permute.xlu1 %372 }
 0x600   :  { %1793 = vmatmul.mubr.msk.bf16.vlgmr.msra.gmra.mrb[4].mxu1 %vm146_vm1, %v373_v14 }
 0x601   :  { %1805 = vmatpush3.bf16.msra.mxu1 %v2293_v4  ;;  %1808 = vmatprep.mubr.msk.bf16.mxu1 %vm2162_vm0, %v2161_v0 }
 0x602   :  { %1806 = vmatprep.subr.bf16.mxu1 %v2161_v0 }
 0x605   :  { %1807 = vmatpush3.bf16.msra.mxu1 %v2295_v5 }
 0x606   :  { %1820 = vmatprep.subr.bf16.mxu1 %v2161_v0 }
 0x6d3   :  { %v411_v15 = vpop.f32.mrb[4].mxu1 }
 0x6d4   :  { %v418_v16 = vrot.slane %v411_v15, 6  ;;  %v1794_v17 = vpop.f32.mrb[5].mxu1 }
 0x6d5   :  { %v414_v18 = vpop.f32.mrb[6].mxu1 }
 0x6d6   :  { %v420_v19 = vadd.f32 %v418_v16, %v2335_v35  ;;  %v1795_v20 = vpop.f32.mrb[7].mxu1 }
 0x6d8   :  { %v421_v21 = vmul.f32 %v420_v19, %v2331_v34 }
 0x6da   :  { %1957 = vtanh.f32 %v421_v21 }
 0x6e4   :  { %v1958_v22 = vpop.eup %1957 }
 0x6e5   :  { %v423_v23 = vmul.f32 %v1958_v22, %v2331_v34 }
 0x6e7   :  { %v424_v24 = vadd.f32 %v423_v23, %v2340_v39 }
 0x6e9   :  { %430 = vrot.lane.b32.xlu0 %v424_v24, %s2165_s4  ;;  %v428_v28 = vmul.f32 %v426_v27, %v424_v24 }
 0x75b   :  { %v431_v25 = vpop.permute.xlu0 %430 }
 0x75c   :  { %v433_v26 = vmul.f32 %v431_v25, %v424_v24 }
 0x75e   :  { %435 = vrot.lane.b32.xlu1 %v433_v26, %s2165_s4 }
 0x7d0   :  { %v436_v30 = vpop.permute.xlu1 %435 }
 0x7d1   :  { %v438_v31 = vadd.f32 %v436_v30, %v428_v28 }
 0x7d3   :  { %1959 = vtanh.f32 %v438_v31  ;;  %v502_v55 = vrot.slane %v438_v31, 7 }
 0x7dd   :  { %v1960_v32 = vpop.eup %1959 }
 0x7de   :  { %441 = vrot.lane.b32.xlu0 %v1960_v32, %s2165_s4 }
 0x850   :  { %v442_v33 = vpop.permute.xlu0 %441 }
 0x851   :  { %v444_v36 = vmul.f32 %v442_v33, %v424_v24 }
 0x853   :  { %v830_v38 = vsel %vm201_vm3, %v829_v37, %v444_v36  ;;  %v445_v40 = vpack.c.bf16 %v444_v36, %v444_v36 }
 0x855   :  { %v447_v41 = vrot.slane %v445_v40, 1 }
 0x857   :  { %448 = vrot.lane.b32.xlu1 %v447_v41, %s2155_s19 }
 0x8c9   :  { %v449_v42 = vpop.permute.xlu1 %448 }
 0x8ca   :  { %1801 = vmatmul.mubr.msk.bf16.vlgmr.msra.gmra.mrb[8].mxu0 %vm146_vm1, %v449_v42 }
 0x8cb   :  { %1813 = vmatpush3.bf16.msra.mxu0 %v2293_v4  ;;  %1816 = vmatprep.mubr.msk.bf16.mxu0 %vm2162_vm0, %v2161_v0 }
 0x8cc   :  { %1814 = vmatprep.subr.bf16.mxu0 %v2161_v0 }
 0x8cf   :  { %1815 = vmatpush3.bf16.msra.mxu0 %v2295_v5 }
 0x8d0   :  { %1828 = vmatprep.subr.bf16.mxu0 %v2161_v0 }
 0x99d   :  { %v487_v43 = vpop.f32.mrb[8].mxu0 }
 0x99e   :  { %v494_v44 = vrot.slane %v487_v43, 5  ;;  %v1802_v45 = vpop.f32.mrb[9].mxu0 }
 0x99f   :  { %v490_v46 = vpop.f32.mrb[10].mxu0 }
 0x9a0   :  { %v496_v47 = vadd.f32 %v494_v44, %v2335_v35  ;;  %v1803_v48 = vpop.f32.mrb[11].mxu0 }
 0x9a2   :  { %v497_v49 = vmul.f32 %v496_v47, %v2331_v34 }
 0x9a4   :  { %1961 = vtanh.f32 %v497_v49 }
 0x9ae   :  { %v1962_v50 = vpop.eup %1961 }
 0x9af   :  { %v499_v51 = vmul.f32 %v1962_v50, %v2331_v34 }
 0x9b1   :  { %v500_v52 = vadd.f32 %v499_v51, %v2340_v39 }
 0x9b3   :  { %506 = vrot.lane.b32.xlu0 %v500_v52, %s2165_s4  ;;  %v504_v56 = vmul.f32 %v502_v55, %v500_v52 }
 0xa25   :  { %v507_v53 = vpop.permute.xlu0 %506 }
 0xa26   :  { %v509_v54 = vmul.f32 %v507_v53, %v500_v52 }
 0xa28   :  { %511 = vrot.lane.b32.xlu1 %v509_v54, %s2165_s4 }
 0xa9a   :  { %v512_v57 = vpop.permute.xlu1 %511 }
 0xa9b   :  { %v514_v58 = vadd.f32 %v512_v57, %v504_v56 }
 0xa9d   :  { %1963 = vtanh.f32 %v514_v58  ;;  %v580_v20 = vrot.slane %v514_v58, 7 }
 0xaa7   :  { %v1964_v59 = vpop.eup %1963 }
 0xaa8   :  { %517 = vrot.lane.b32.xlu0 %v1964_v59, %s2165_s4 }
 0xb1a   :  { %v518_v60 = vpop.permute.xlu0 %517 }
 0xb1b   :  { %v520_v61 = vmul.f32 %v518_v60, %v500_v52 }
 0xb1d   :  { %v831_v62 = vsel %vm203_vm4, %v830_v38, %v520_v61  ;;  %v521_v63 = vpack.c.bf16 %v520_v61, %v520_v61 }
 0xb1f   :  { %v523_v1 = vshrl.u32 %v521_v63, 16 }
 0xb21   :  { %v525_v2 = vrot.slane %v523_v1, 1 }
 0xb23   :  { %526 = vrot.lane.b32.xlu1 %v525_v2, %s2155_s19 }
 0xb95   :  { %v527_v3 = vpop.permute.xlu1 %526 }
 0xb96   :  { %1809 = vmatmul.mubr.msk.bf16.vlgmr.msra.gmra.mrb[8].mxu1 %vm146_vm1, %v527_v3 }
 0xb97   :  { %1821 = vmatpush3.bf16.msra.mxu1 %v2293_v4  ;;  %1824 = vmatprep.mubr.msk.bf16.mxu1 %vm2162_vm0, %v2161_v0 }
 0xb98   :  { %1822 = vmatprep.subr.bf16.mxu1 %v2161_v0 }
 0xb9b   :  { %1823 = vmatpush3.bf16.msra.mxu1 %v2295_v5 }
 0xb9c   :  { %1836 = vmatprep.subr.bf16.mxu1 %v2161_v0 }
 0xc69   :  { %v565_v6 = vpop.f32.mrb[8].mxu1 }
 0xc6a   :  { %v572_v8 = vrot.slane %v565_v6, 4  ;;  %v1810_v9 = vpop.f32.mrb[9].mxu1 }
 0xc6b   :  { %v568_v10 = vpop.f32.mrb[10].mxu1 }
 0xc6c   :  { %v574_v12 = vadd.f32 %v572_v8, %v2335_v35  ;;  %v1811_v13 = vpop.f32.mrb[11].mxu1 }
 0xc6e   :  { %v575_v14 = vmul.f32 %v574_v12, %v2331_v34 }
 0xc70   :  { %1965 = vtanh.f32 %v575_v14 }
 0xc7a   :  { %v1966_v15 = vpop.eup %1965 }
 0xc7b   :  { %v577_v16 = vmul.f32 %v1966_v15, %v2331_v34 }
 0xc7d   :  { %v578_v17 = vadd.f32 %v577_v16, %v2340_v39 }
 0xc7f   :  { %584 = vrot.lane.b32.xlu0 %v578_v17, %s2165_s4  ;;  %v582_v21 = vmul.f32 %v580_v20, %v578_v17 }
 0xcf1   :  { %v585_v18 = vpop.permute.xlu0 %584 }
 0xcf2   :  { %v587_v19 = vmul.f32 %v585_v18, %v578_v17 }
 0xcf4   :  { %589 = vrot.lane.b32.xlu1 %v587_v19, %s2165_s4 }
 0xd66   :  { %v590_v22 = vpop.permute.xlu1 %589 }
 0xd67   :  { %v592_v23 = vadd.f32 %v590_v22, %v582_v21 }
 0xd69   :  { %1967 = vtanh.f32 %v592_v23  ;;  %v656_v45 = vrot.slane %v592_v23, 7 }
 0xd73   :  { %v1968_v24 = vpop.eup %1967 }
 0xd74   :  { %595 = vrot.lane.b32.xlu0 %v1968_v24, %s2165_s4 }
 0xde6   :  { %v596_v25 = vpop.permute.xlu0 %595 }
 0xde7   :  { %v598_v26 = vmul.f32 %v596_v25, %v578_v17 }
 0xde9   :  { %v832_v27 = vsel %vm205_vm5, %v831_v62, %v598_v26  ;;  %v599_v28 = vpack.c.bf16 %v598_v26, %v598_v26 }
 0xdeb   :  { %v601_v30 = vrot.slane %v599_v28, 2 }
 0xded   :  { %602 = vrot.lane.b32.xlu1 %v601_v30, %s2155_s19 }
 0xe5f   :  { %v603_v31 = vpop.permute.xlu1 %602 }
 0xe60   :  { %1817 = vmatmul.mubr.msk.bf16.vlgmr.msra.gmra.mrb[12].mxu0 %vm146_vm1, %v603_v31 }
 0xe61   :  { %1829 = vmatpush3.bf16.msra.mxu0 %v2293_v4  ;;  %1832 = vmatprep.mubr.msk.bf16.mxu0 %vm2162_vm0, %v2161_v0 }
 0xe62   :  { %1830 = vmatprep.subr.bf16.mxu0 %v2161_v0 }
 0xe65   :  { %1831 = vmatpush3.bf16.msra.mxu0 %v2295_v5 }
 0xe66   :  { %1844 = vmatprep.subr.bf16.mxu0 %v2161_v0 }
 0xf33   :  { %v641_v32 = vpop.f32.mrb[12].mxu0 }
 0xf34   :  { %v648_v33 = vrot.slane %v641_v32, 3  ;;  %v1818_v36 = vpop.f32.mrb[13].mxu0 }
 0xf35   :  { %v644_v37 = vpop.f32.mrb[14].mxu0 }
 0xf36   :  { %v650_v38 = vadd.f32 %v648_v33, %v2335_v35  ;;  %v1819_v40 = vpop.f32.mrb[15].mxu0 }
 0xf38   :  { %v651_v41 = vmul.f32 %v650_v38, %v2331_v34 }
 0xf3a   :  { %1969 = vtanh.f32 %v651_v41  ;;  %v1943_v41 = vld [vmem:[#allocation10] sm:$0xff]  }
 0xf44   :  { %v1970_v4 = vpop.eup %1969 }
 0xf45   :  { %v653_v42 = vmul.f32 %v1970_v4, %v2331_v34 }
 0xf47   :  { %v654_v43 = vadd.f32 %v653_v42, %v2340_v39 }
 0xf49   :  { %660 = vrot.lane.b32.xlu0 %v654_v43, %s2165_s4  ;;  %v658_v46 = vmul.f32 %v656_v45, %v654_v43 }
 0xfbb   :  { %v661_v5 = vpop.permute.xlu0 %660 }
 0xfbc   :  { %v663_v44 = vmul.f32 %v661_v5, %v654_v43 }
 0xfbe   :  { %665 = vrot.lane.b32.xlu1 %v663_v44, %s2165_s4 }
0x1030   :  { %v666_v47 = vpop.permute.xlu1 %665 }
0x1031   :  { %v668_v48 = vadd.f32 %v666_v47, %v658_v46 }
0x1033   :  { %1971 = vtanh.f32 %v668_v48  ;;  %v734_v9 = vrot.slane %v668_v48, 7 }
0x103d   :  { %v1972_v49 = vpop.eup %1971 }
0x103e   :  { %671 = vrot.lane.b32.xlu0 %v1972_v49, %s2165_s4 }
0x10b0   :  { %v672_v50 = vpop.permute.xlu0 %671 }
0x10b1   :  { %v674_v51 = vmul.f32 %v672_v50, %v654_v43  ;;  %v1944_v43 = vld [vmem:[#allocation10 + $0x8] sm:$0xff]   ;;  %v2463_v50 = vld [vmem:[%s2663_s5] sm:$0xff]  }
0x10b3   :  { %v833_v52 = vsel %vm207_vm6, %v832_v27, %v674_v51  ;;  %v675_v53 = vpack.c.bf16 %v674_v51, %v674_v51 }
0x10b5   :  { %v677_v54 = vshrl.u32 %v675_v53, 16  ;;  %v2471_v53 = vld [vmem:[%s2663_s5 + $0x8] sm:$0xff]  }
0x10b7   :  { %v679_v55 = vrot.slane %v677_v54, 2 }
0x10b9   :  { %680 = vrot.lane.b32.xlu1 %v679_v55, %s2155_s19 }
0x112b   :  { %v681_v56 = vpop.permute.xlu1 %680 }
0x112c   :  { %1825 = vmatmul.mubr.msk.bf16.vlgmr.msra.gmra.mrb[12].mxu1 %vm146_vm1, %v681_v56 }
0x112d   :  { %1840 = vmatprep.mubr.msk.bf16.mxu1 %vm2162_vm0, %v2161_v0  ;;  %1837 = vmatpush3.bf16.msra.mxu1 %v1943_v41 }
0x112e   :  { %1838 = vmatprep.subr.bf16.mxu1 %v2161_v0 }
0x1131   :  { %1839 = vmatpush3.bf16.msra.mxu1 %v1944_v43 }
0x1132   :  { %1852 = vmatprep.subr.bf16.mxu1 %v2161_v0 }
0x11ff   :  { %v719_v57 = vpop.f32.mrb[12].mxu1 }
0x1200   :  { %v726_v58 = vrot.slane %v719_v57, 2  ;;  %v1826_v59 = vpop.f32.mrb[13].mxu1 }
0x1201   :  { %v722_v60 = vpop.f32.mrb[14].mxu1 }
0x1202   :  { %v728_v61 = vadd.f32 %v726_v58, %v2335_v35  ;;  %v1827_v62 = vpop.f32.mrb[15].mxu1 }
0x1204   :  { %v729_v63 = vmul.f32 %v728_v61, %v2331_v34 }
0x1206   :  { %1973 = vtanh.f32 %v729_v63 }
0x1210   :  { %v1974_v1 = vpop.eup %1973 }
0x1211   :  { %v731_v2 = vmul.f32 %v1974_v1, %v2331_v34 }
0x1213   :  { %v732_v3 = vadd.f32 %v731_v2, %v2340_v39 }
0x1215   :  { %738 = vrot.lane.b32.xlu0 %v732_v3, %s2165_s4  ;;  %v736_v10 = vmul.f32 %v734_v9, %v732_v3 }
0x1287   :  { %v739_v6 = vpop.permute.xlu0 %738 }
0x1288   :  { %v741_v8 = vmul.f32 %v739_v6, %v732_v3 }
0x128a   :  { %743 = vrot.lane.b32.xlu1 %v741_v8, %s2165_s4 }
0x12fc   :  { %v744_v12 = vpop.permute.xlu1 %743 }
0x12fd   :  { %v746_v13 = vadd.f32 %v744_v12, %v736_v10 }
0x12ff   :  { %1975 = vtanh.f32 %v746_v13  ;;  %v810_v36 = vrot.slane %v746_v13, 7 }
0x1309   :  { %v1976_v14 = vpop.eup %1975 }
0x130a   :  { %749 = vrot.lane.b32.xlu0 %v1976_v14, %s2165_s4 }
0x137c   :  { %v750_v15 = vpop.permute.xlu0 %749 }
0x137d   :  { %v752_v16 = vmul.f32 %v750_v15, %v732_v3  ;;  %v1690_v3 = vld [vmem:[%s2664_s6] ss:$0 sm:$0xff] }
0x137f   :  { %v834_v17 = vsel %vm209_vm7, %v833_v52, %v752_v16  ;;  %v753_v18 = vpack.c.bf16 %v752_v16, %v752_v16 }
0x1381   :  { %v755_v19 = vrot.slane %v753_v18, 3 }
0x1383   :  { %756 = vrot.lane.b32.xlu1 %v755_v19, %s2155_s19 }
0x13f5   :  { %v757_v20 = vpop.permute.xlu1 %756 }
0x13f6   :  { %1833 = vmatmul.mubr.msk.bf16.vlgmr.msra.gmra.mrb[16].mxu0 %vm146_vm1, %v757_v20 }
0x13f7   :  { %1848 = vmatprep.mubr.msk.bf16.mxu0 %vm2162_vm0, %v2161_v0  ;;  %1845 = vmatpush3.bf16.msra.mxu0 %v2463_v50 }
0x13f8   :  { %1846 = vmatprep.subr.bf16.mxu0 %v2161_v0 }
0x13fb   :  { %1847 = vmatpush3.bf16.msra.mxu0 %v2471_v53 }
0x13fc   :  { %1860 = vmatprep.subr.bf16.mxu0 %v2161_v0 }
0x13fe   :  { %1849 = vmatmul.mubr.bf16.vlgmr.msra.gmra.mrb[20].mxu0 %v2163_v7 }
0x13ff   :  { %1861 = vmatpush3.bf16.msra.mxu0 %v2463_v50  ;;  %1864 = vmatprep.mubr.msk.bf16.mxu0 %vm2162_vm0, %v2161_v0 }
0x1400   :  { %1862 = vmatprep.subr.bf16.mxu0 %v2161_v0 }
0x1403   :  { %1863 = vmatpush3.bf16.msra.mxu0 %v2471_v53 }
0x1404   :  { %1876 = vmatprep.subr.bf16.mxu0 %v2161_v0 }
0x14c9   :  { %v795_v21 = vpop.f32.mrb[16].mxu0 }
0x14ca   :  { %v802_v22 = vrot.slane %v795_v21, 1  ;;  %v1834_v23 = vpop.f32.mrb[17].mxu0 }
0x14cb   :  { %v798_v24 = vpop.f32.mrb[18].mxu0 }
0x14cc   :  { %v804_v25 = vadd.f32 %v802_v22, %v2335_v35  ;;  %v1835_v26 = vpop.f32.mrb[19].mxu0 }
0x14ce   :  { %v805_v27 = vmul.f32 %v804_v25, %v2331_v34 }
0x14d0   :  { %1977 = vtanh.f32 %v805_v27 }
0x14d1   :  { %v996_v62 = vpop.f32.mrb[20].mxu0 }
0x14d2   :  { %v1850_v63 = vpop.f32.mrb[21].mxu0 }
0x14d3   :  { %v999_v1 = vpop.f32.mrb[22].mxu0 }
0x14d4   :  { %v1851_v2 = vpop.f32.mrb[23].mxu0 }
0x14da   :  { %v1978_v28 = vpop.eup %1977 }
0x14db   :  { %v807_v30 = vmul.f32 %v1978_v28, %v2331_v34 }
0x14dd   :  { %v808_v31 = vadd.f32 %v807_v30, %v2340_v39 }
0x14df   :  { %814 = vrot.lane.b32.xlu0 %v808_v31, %s2165_s4  ;;  %v812_v37 = vmul.f32 %v810_v36, %v808_v31 }
0x1551   :  { %v815_v32 = vpop.permute.xlu0 %814 }
0x1552   :  { %v817_v33 = vmul.f32 %v815_v32, %v808_v31 }
0x1554   :  { %819 = vrot.lane.b32.xlu1 %v817_v33, %s2165_s4 }
0x15c6   :  { %v820_v38 = vpop.permute.xlu1 %819 }
0x15c7   :  { %v822_v40 = vadd.f32 %v820_v38, %v812_v37 }
0x15c9   :  { %1979 = vtanh.f32 %v822_v40 }
0x15d3   :  { %v1980_v35 = vpop.eup %1979 }
0x15d4   :  { %825 = vrot.lane.b32.xlu0 %v1980_v35, %s2165_s4 }
0x1646   :  { %v826_v4 = vpop.permute.xlu0 %825 }
0x1647   :  { %v828_v42 = vmul.f32 %v826_v4, %v808_v31 }
0x1649   :  { %v835_v5 = vsel %vm211_vm8, %v834_v17, %v828_v42 }
0x164a   :  { %v837_v44 = vrot.slane %v835_v5, 7  ;;  %v839_v45 = vrot.slane %v835_v5, 5  ;;  %v841_v46 = vrot.slane %v835_v5, 3  ;;  %v843_v48 = vrot.slane %v835_v5, 1 }
0x164c   :  { %v845_v47 = vsel %vm199_vm2, %v837_v44, %v839_v45 }
0x164d   :  { %v846_v49 = vsel %vm201_vm3, %v845_v47, %v841_v46 }
0x164e   :  { %v847_v51 = vsel %vm203_vm4, %v846_v49, %v843_v48 }
0x164f   :  { %v848_v52 = vsel %vm205_vm5, %v847_v51, %v837_v44 }
0x1650   :  { %v849_v54 = vsel %vm207_vm6, %v848_v52, %v839_v45 }
0x1651   :  { %v850_v55 = vsel %vm209_vm7, %v849_v54, %v841_v46 }
0x1652   :  { %v851_v56 = vsel %vm211_vm8, %v850_v55, %v843_v48 }
0x1653   :  { %v1929_v57 = vpack.i.bf16 %v851_v56, %v835_v5 }
0x1655   :  { %1930 = vrot.lane.b32.xlu1 %v1929_v57, %s2155_s19 }
0x16c7   :  { %v1931_v58 = vpop.permute.xlu1 %1930 }
0x16c8   :  { %v1933_v59 = vunpack.i.h.bf16 %v1931_v58  ;;  %v1932_v60 = vunpack.i.l.bf16 %v1931_v58 }
0x16ca   :  { %v861_v61 = vsel %vm114_vm11, %v1932_v60, %v1933_v59 }
0x16cb   :  { %v866_v7 = vpack.c.bf16 %v861_v61, %v861_v61 }
0x16cd   :  { %1841 = vmatmul.mubr.msk.bf16.vlgmr.msra.gmra.mrb[16].mxu1 %vm146_vm1, %v866_v7 }
0x16ce   :  { %1853 = vmatpush3.bf16.msra.mxu1 %v2463_v50  ;;  %1856 = vmatprep.mubr.msk.bf16.mxu1 %vm2162_vm0, %v2161_v0 }
0x16cf   :  { %1854 = vmatprep.subr.bf16.mxu1 %v2161_v0 }
0x16d2   :  { %1855 = vmatpush3.bf16.msra.mxu1 %v2471_v53 }
0x16d3   :  { %1868 = vmatprep.subr.bf16.mxu1 %v2161_v0 }
0x17a0   :  { %v927_v6 = vpop.f32.mrb[16].mxu1 }
0x17a1   :  { %v928_v8 = vadd.f32 %v1690_v3, %v927_v6  ;;  %v1842_v9 = vpop.f32.mrb[17].mxu1 }
0x17a2   :  { %v930_v10 = vpop.f32.mrb[18].mxu1 }
0x17a3   :  { %v934_v12 = vrot.slane %v928_v8, 7  ;;  %v936_v13 = vrot.slane %v928_v8, 5  ;;  %v938_v14 = vrot.slane %v928_v8, 3  ;;  %v1843_v15 = vpop.f32.mrb[19].mxu1  ;;  %v940_v16 = vrot.slane %v928_v8, 1 }
0x17a5   :  { %v942_v17 = vsel %vm199_vm2, %v934_v12, %v936_v13 }
0x17a6   :  { %v943_v18 = vsel %vm201_vm3, %v942_v17, %v938_v14 }
0x17a7   :  { %v944_v19 = vsel %vm203_vm4, %v943_v18, %v940_v16 }
0x17a8   :  { %v945_v20 = vsel %vm205_vm5, %v944_v19, %v934_v12 }
0x17a9   :  { %v946_v21 = vsel %vm207_vm6, %v945_v20, %v936_v13 }
0x17aa   :  { %v947_v22 = vsel %vm209_vm7, %v946_v21, %v938_v14 }
0x17ab   :  { %v948_v23 = vsel %vm211_vm8, %v947_v22, %v940_v16 }
0x17ac   :  { %v2509_v24 = vsel %vm2323_vm9, %v928_v8, %v948_v23 }
0x17ad   :  { %v1002_v25 = vadd.f32 %v996_v62, %v2509_v24 }
0x17af   :  { %v1003_v26 = vmul.f32 %v1002_v25, %v2331_v34 }
0x17b1   :  { %1981 = vtanh.f32 %v1003_v26 }
0x17bb   :  { %v1982_v27 = vpop.eup %1981 }
0x17bc   :  { %v1005_v28 = vmul.f32 %v1982_v27, %v2331_v34 }
0x17be   :  { %v1006_v30 = vadd.f32 %v1005_v28, %v2340_v39 }
0x17c0   :  { %1009 = vrot.lane.b32.xlu0 %v1006_v30, %s2165_s4  ;;  %v1007_v33 = vmul.f32 0.0, %v1006_v30 }
0x1832   :  { %v1010_v31 = vpop.permute.xlu0 %1009 }
0x1833   :  { %v1012_v32 = vmul.f32 %v1010_v31, %v1006_v30 }
0x1835   :  { %1014 = vrot.lane.b32.xlu1 %v1012_v32, %s2165_s4 }
0x18a7   :  { %v1015_v29 = vpop.permute.xlu1 %1014 }
0x18a8   :  { %v1017_v36 = vadd.f32 %v1015_v29, %v1007_v33 }
0x18aa   :  { %1983 = vtanh.f32 %v1017_v36  ;;  %v1080_v54 = vrot.slane %v1017_v36, 7 }
0x18b4   :  { %v1984_v37 = vpop.eup %1983 }
0x18b5   :  { %1020 = vrot.lane.b32.xlu0 %v1984_v37, %s2165_s4 }
0x1927   :  { %v1021_v38 = vpop.permute.xlu0 %1020 }
0x1928   :  { %v2518_v40 = vmul.f32 %v1021_v38, %v1006_v30 }
0x192a   :  { %v1024_v35 = vpack.c.bf16 %v2518_v40, %v2518_v40 }
0x192c   :  { %1026 = vrot.lane.b32.xlu1 %v1024_v35, %s2155_s19 }
0x199e   :  { %v1027_v41 = vpop.permute.xlu1 %1026 }
0x199f   :  { %1857 = vmatmul.mubr.msk.bf16.vlgmr.msra.gmra.mrb[20].mxu1 %vm146_vm1, %v1027_v41 }
0x19a0   :  { %1869 = vmatpush3.bf16.msra.mxu1 %v2463_v50  ;;  %1872 = vmatprep.mubr.msk.bf16.mxu1 %vm2162_vm0, %v2161_v0 }
0x19a1   :  { %1870 = vmatprep.subr.bf16.mxu1 %v2161_v0 }
0x19a4   :  { %1871 = vmatpush3.bf16.msra.mxu1 %v2471_v53 }
0x19a5   :  { %1884 = vmatprep.subr.bf16.mxu1 %v2161_v0 }
0x1a72   :  { %v1065_v4 = vpop.f32.mrb[20].mxu1 }
0x1a73   :  { %v1072_v42 = vrot.slane %v1065_v4, 7  ;;  %v1858_v43 = vpop.f32.mrb[21].mxu1 }
0x1a74   :  { %v1068_v5 = vpop.f32.mrb[22].mxu1 }
0x1a75   :  { %v1074_v44 = vadd.f32 %v1072_v42, %v2509_v24  ;;  %v1859_v45 = vpop.f32.mrb[23].mxu1 }
0x1a77   :  { %v1075_v46 = vmul.f32 %v1074_v44, %v2331_v34 }
0x1a79   :  { %1985 = vtanh.f32 %v1075_v46 }
0x1a83   :  { %v1986_v47 = vpop.eup %1985 }
0x1a84   :  { %v1077_v48 = vmul.f32 %v1986_v47, %v2331_v34 }
0x1a86   :  { %v1078_v49 = vadd.f32 %v1077_v48, %v2340_v39 }
0x1a88   :  { %1084 = vrot.lane.b32.xlu0 %v1078_v49, %s2165_s4  ;;  %v1082_v55 = vmul.f32 %v1080_v54, %v1078_v49 }
0x1afa   :  { %v1085_v51 = vpop.permute.xlu0 %1084 }
0x1afb   :  { %v1087_v52 = vmul.f32 %v1085_v51, %v1078_v49 }
0x1afd   :  { %1089 = vrot.lane.b32.xlu1 %v1087_v52, %s2165_s4 }
0x1b6f   :  { %v1090_v56 = vpop.permute.xlu1 %1089 }
0x1b70   :  { %v1092_v57 = vadd.f32 %v1090_v56, %v1082_v55 }
0x1b72   :  { %1987 = vtanh.f32 %v1092_v57  ;;  %v1157_v16 = vrot.slane %v1092_v57, 7 }
0x1b7c   :  { %v1988_v58 = vpop.eup %1987 }
0x1b7d   :  { %1095 = vrot.lane.b32.xlu0 %v1988_v58, %s2165_s4 }
0x1bef   :  { %v1096_v59 = vpop.permute.xlu0 %1095 }
0x1bf0   :  { %v1098_v60 = vmul.f32 %v1096_v59, %v1078_v49 }
0x1bf2   :  { %v1099_v61 = vpack.c.bf16 %v1098_v60, %v1098_v60  ;;  %v1560_v23 = vsel %vm199_vm2, %v2518_v40, %v1098_v60 }
0x1bf4   :  { %v1101_v7 = vshrl.u32 %v1099_v61, 16 }
0x1bf6   :  { %1103 = vrot.lane.b32.xlu1 %v1101_v7, %s2155_s19 }
0x1c68   :  { %v1104_v62 = vpop.permute.xlu1 %1103 }
0x1c69   :  { %1865 = vmatmul.mubr.msk.bf16.vlgmr.msra.gmra.mrb[24].mxu0 %vm146_vm1, %v1104_v62 }
0x1c6a   :  { %1877 = vmatpush3.bf16.msra.mxu0 %v2463_v50  ;;  %1880 = vmatprep.mubr.msk.bf16.mxu0 %vm2162_vm0, %v2161_v0 }
0x1c6b   :  { %1878 = vmatprep.subr.bf16.mxu0 %v2161_v0 }
0x1c6e   :  { %1879 = vmatpush3.bf16.msra.mxu0 %v2471_v53 }
0x1c6f   :  { %1892 = vmatprep.subr.bf16.mxu0 %v2161_v0 }
0x1d3c   :  { %v1142_v63 = vpop.f32.mrb[24].mxu0 }
0x1d3d   :  { %v1149_v1 = vrot.slane %v1142_v63, 6  ;;  %v1866_v2 = vpop.f32.mrb[25].mxu0 }
0x1d3e   :  { %v1145_v3 = vpop.f32.mrb[26].mxu0 }
0x1d3f   :  { %v1151_v6 = vadd.f32 %v1149_v1, %v2509_v24  ;;  %v1867_v8 = vpop.f32.mrb[27].mxu0 }
0x1d41   :  { %v1152_v9 = vmul.f32 %v1151_v6, %v2331_v34 }
0x1d43   :  { %1989 = vtanh.f32 %v1152_v9 }
0x1d4d   :  { %v1990_v10 = vpop.eup %1989 }
0x1d4e   :  { %v1154_v12 = vmul.f32 %v1990_v10, %v2331_v34 }
0x1d50   :  { %v1155_v13 = vadd.f32 %v1154_v12, %v2340_v39 }
0x1d52   :  { %1161 = vrot.lane.b32.xlu0 %v1155_v13, %s2165_s4  ;;  %v1159_v17 = vmul.f32 %v1157_v16, %v1155_v13 }
0x1dc4   :  { %v1162_v14 = vpop.permute.xlu0 %1161 }
0x1dc5   :  { %v1164_v15 = vmul.f32 %v1162_v14, %v1155_v13 }
0x1dc7   :  { %1166 = vrot.lane.b32.xlu1 %v1164_v15, %s2165_s4 }
0x1e39   :  { %v1167_v18 = vpop.permute.xlu1 %1166 }
0x1e3a   :  { %v1169_v19 = vadd.f32 %v1167_v18, %v1159_v17 }
0x1e3c   :  { %1991 = vtanh.f32 %v1169_v19  ;;  %v1233_v42 = vrot.slane %v1169_v19, 7 }
0x1e46   :  { %v1992_v20 = vpop.eup %1991 }
0x1e47   :  { %1172 = vrot.lane.b32.xlu0 %v1992_v20, %s2165_s4 }
0x1eb9   :  { %v1173_v21 = vpop.permute.xlu0 %1172 }
0x1eba   :  { %v1175_v22 = vmul.f32 %v1173_v21, %v1155_v13 }
0x1ebc   :  { %v1561_v25 = vsel %vm201_vm3, %v1560_v23, %v1175_v22  ;;  %v1176_v26 = vpack.c.bf16 %v1175_v22, %v1175_v22 }
0x1ebe   :  { %v1178_v27 = vrot.slane %v1176_v26, 1 }
0x1ec0   :  { %1179 = vrot.lane.b32.xlu1 %v1178_v27, %s2155_s19 }
0x1f32   :  { %v1180_v28 = vpop.permute.xlu1 %1179 }
0x1f33   :  { %1873 = vmatmul.mubr.msk.bf16.vlgmr.msra.gmra.mrb[24].mxu1 %vm146_vm1, %v1180_v28 }
0x1f34   :  { %1885 = vmatpush3.bf16.msra.mxu1 %v2463_v50  ;;  %1888 = vmatprep.mubr.msk.bf16.mxu1 %vm2162_vm0, %v2161_v0 }
0x1f35   :  { %1886 = vmatprep.subr.bf16.mxu1 %v2161_v0 }
0x1f38   :  { %1887 = vmatpush3.bf16.msra.mxu1 %v2471_v53 }
0x1f39   :  { %1900 = vmatprep.subr.bf16.mxu1 %v2161_v0 }
0x2006   :  { %v1218_v30 = vpop.f32.mrb[24].mxu1 }
0x2007   :  { %v1225_v31 = vrot.slane %v1218_v30, 5  ;;  %v1874_v32 = vpop.f32.mrb[25].mxu1 }
0x2008   :  { %v1221_v33 = vpop.f32.mrb[26].mxu1 }
0x2009   :  { %v1227_v29 = vadd.f32 %v1225_v31, %v2509_v24  ;;  %v1875_v36 = vpop.f32.mrb[27].mxu1 }
0x200b   :  { %v1228_v37 = vmul.f32 %v1227_v29, %v2331_v34 }
0x200d   :  { %1993 = vtanh.f32 %v1228_v37 }
0x2017   :  { %v1994_v38 = vpop.eup %1993 }
0x2018   :  { %v1230_v40 = vmul.f32 %v1994_v38, %v2331_v34 }
0x201a   :  { %v1231_v35 = vadd.f32 %v1230_v40, %v2340_v39 }
0x201c   :  { %1237 = vrot.lane.b32.xlu0 %v1231_v35, %s2165_s4  ;;  %v1235_v43 = vmul.f32 %v1233_v42, %v1231_v35 }
0x208e   :  { %v1238_v41 = vpop.permute.xlu0 %1237 }
0x208f   :  { %v1240_v4 = vmul.f32 %v1238_v41, %v1231_v35 }
0x2091   :  { %1242 = vrot.lane.b32.xlu1 %v1240_v4, %s2165_s4 }
0x2103   :  { %v1243_v5 = vpop.permute.xlu1 %1242 }
0x2104   :  { %v1245_v44 = vadd.f32 %v1243_v5, %v1235_v43 }
0x2106   :  { %1995 = vtanh.f32 %v1245_v44  ;;  %v1311_v3 = vrot.slane %v1245_v44, 7 }
0x2110   :  { %v1996_v45 = vpop.eup %1995 }
0x2111   :  { %1248 = vrot.lane.b32.xlu0 %v1996_v45, %s2165_s4 }
0x2183   :  { %v1249_v46 = vpop.permute.xlu0 %1248 }
0x2184   :  { %v1251_v47 = vmul.f32 %v1249_v46, %v1231_v35 }
0x2186   :  { %v1562_v48 = vsel %vm203_vm4, %v1561_v25, %v1251_v47  ;;  %v1252_v49 = vpack.c.bf16 %v1251_v47, %v1251_v47 }
0x2188   :  { %v1254_v51 = vshrl.u32 %v1252_v49, 16 }
0x218a   :  { %v1256_v52 = vrot.slane %v1254_v51, 1 }
0x218c   :  { %1257 = vrot.lane.b32.xlu1 %v1256_v52, %s2155_s19 }
0x21fe   :  { %v1258_v54 = vpop.permute.xlu1 %1257 }
0x21ff   :  { %1881 = vmatmul.mubr.msk.bf16.vlgmr.msra.gmra.mrb[28].mxu0 %vm146_vm1, %v1258_v54 }
0x2200   :  { %1893 = vmatpush3.bf16.msra.mxu0 %v2463_v50  ;;  %1896 = vmatprep.mubr.msk.bf16.mxu0 %vm2162_vm0, %v2161_v0 }
0x2201   :  { %1894 = vmatprep.subr.bf16.mxu0 %v2161_v0 }
0x2204   :  { %1895 = vmatpush3.bf16.msra.mxu0 %v2471_v53 }
0x2205   :  { %1908 = vmatprep.subr.bf16.mxu0 %v2161_v0 }
0x22d2   :  { %v1296_v55 = vpop.f32.mrb[28].mxu0 }
0x22d3   :  { %v1303_v56 = vrot.slane %v1296_v55, 4  ;;  %v1882_v57 = vpop.f32.mrb[29].mxu0 }
0x22d4   :  { %v1299_v58 = vpop.f32.mrb[30].mxu0 }
0x22d5   :  { %v1305_v59 = vadd.f32 %v1303_v56, %v2509_v24  ;;  %v1883_v60 = vpop.f32.mrb[31].mxu0 }
0x22d7   :  { %v1306_v61 = vmul.f32 %v1305_v59, %v2331_v34 }
0x22d9   :  { %1997 = vtanh.f32 %v1306_v61 }
0x22e3   :  { %v1998_v7 = vpop.eup %1997 }
0x22e4   :  { %v1308_v62 = vmul.f32 %v1998_v7, %v2331_v34 }
0x22e6   :  { %v1309_v63 = vadd.f32 %v1308_v62, %v2340_v39 }
0x22e8   :  { %1315 = vrot.lane.b32.xlu0 %v1309_v63, %s2165_s4  ;;  %v1313_v6 = vmul.f32 %v1311_v3, %v1309_v63 }
0x235a   :  { %v1316_v1 = vpop.permute.xlu0 %1315 }
0x235b   :  { %v1318_v2 = vmul.f32 %v1316_v1, %v1309_v63 }
0x235d   :  { %1320 = vrot.lane.b32.xlu1 %v1318_v2, %s2165_s4 }
0x23cf   :  { %v1321_v8 = vpop.permute.xlu1 %1320 }
0x23d0   :  { %v1323_v9 = vadd.f32 %v1321_v8, %v1313_v6 }
0x23d2   :  { %1999 = vtanh.f32 %v1323_v9 }
0x23dc   :  { %v2000_v10 = vpop.eup %1999 }
0x23dd   :  { %1326 = vrot.lane.b32.xlu0 %v2000_v10, %s2165_s4 }
0x244f   :  { %v1327_v12 = vpop.permute.xlu0 %1326 }
0x2450   :  { %v1329_v13 = vmul.f32 %v1327_v12, %v1309_v63 }
0x2452   :  { %v1563_v14 = vsel %vm205_vm5, %v1562_v48, %v1329_v13  ;;  %v1330_v15 = vpack.c.bf16 %v1329_v13, %v1329_v13 }
0x2454   :  { %v1332_v16 = vrot.slane %v1330_v15, 2 }
0x2456   :  { %1333 = vrot.lane.b32.xlu1 %v1332_v16, %s2155_s19 }
0x24c8   :  { %v1334_v17 = vpop.permute.xlu1 %1333 }
0x24c9   :  { %1889 = vmatmul.mubr.msk.bf16.vlgmr.msra.gmra.mrb[28].mxu1 %vm146_vm1, %v1334_v17 }
0x24ca   :  { %1901 = vmatpush3.bf16.msra.mxu1 %v2463_v50  ;;  %1904 = vmatprep.mubr.msk.bf16.mxu1 %vm2162_vm0, %v2161_v0 }
0x24cb   :  { %1902 = vmatprep.subr.bf16.mxu1 %v2161_v0 }
0x24ce   :  { %1903 = vmatpush3.bf16.msra.mxu1 %v2471_v53  ;;  %v1387_v53 = vrot.slane %v1323_v9, 7 }
0x259c   :  { %v1372_v18 = vpop.f32.mrb[28].mxu1 }
0x259d   :  { %v1379_v19 = vrot.slane %v1372_v18, 3  ;;  %v1890_v20 = vpop.f32.mrb[29].mxu1 }
0x259e   :  { %v1375_v21 = vpop.f32.mrb[30].mxu1 }
0x259f   :  { %v1381_v22 = vadd.f32 %v1379_v19, %v2509_v24  ;;  %v1891_v23 = vpop.f32.mrb[31].mxu1 }
0x25a0   :  { %v1948_v23 = vld [vmem:[%s2665_s7 + $0x8] sm:$0xff]  }
0x25a1   :  { %v1382_v25 = vmul.f32 %v1381_v22, %v2331_v34 }
0x25a3   :  { %2001 = vtanh.f32 %v1382_v25 }
0x25ad   :  { %v2002_v26 = vpop.eup %2001 }
0x25ae   :  { %v1384_v50 = vmul.f32 %v2002_v26, %v2331_v34 }
0x25b0   :  { %v1385_v27 = vadd.f32 %v1384_v50, %v2340_v39 }
0x25b2   :  { %1391 = vrot.lane.b32.xlu0 %v1385_v27, %s2165_s4  ;;  %v1389_v31 = vmul.f32 %v1387_v53, %v1385_v27 }
0x2624   :  { %v1392_v28 = vpop.permute.xlu0 %1391 }
0x2625   :  { %v1394_v30 = vmul.f32 %v1392_v28, %v1385_v27 }
0x2627   :  { %1396 = vrot.lane.b32.xlu1 %v1394_v30, %s2165_s4 }
0x2699   :  { %v1397_v32 = vpop.permute.xlu1 %1396 }
0x269a   :  { %v1399_v33 = vadd.f32 %v1397_v32, %v1389_v31 }
0x269c   :  { %2003 = vtanh.f32 %v1399_v33  ;;  %v1465_v55 = vrot.slane %v1399_v33, 7 }
0x26a6   :  { %v2004_v29 = vpop.eup %2003 }
0x26a7   :  { %1402 = vrot.lane.b32.xlu0 %v2004_v29, %s2165_s4 }
0x2719   :  { %v1403_v36 = vpop.permute.xlu0 %1402 }
0x271a   :  { %v1405_v37 = vmul.f32 %v1403_v36, %v1385_v27 }
0x271c   :  { %v1564_v38 = vsel %vm207_vm6, %v1563_v14, %v1405_v37  ;;  %v1406_v40 = vpack.c.bf16 %v1405_v37, %v1405_v37 }
0x271e   :  { %v1408_v35 = vshrl.u32 %v1406_v40, 16 }
0x2720   :  { %v1410_v41 = vrot.slane %v1408_v35, 2 }
0x2722   :  { %1411 = vrot.lane.b32.xlu1 %v1410_v41, %s2155_s19 }
0x2794   :  { %v1412_v4 = vpop.permute.xlu1 %1411 }
0x2795   :  { %1897 = vmatmul.mubr.msk.bf16.vlgmr.msra.gmra.mrb[32].mxu0 %vm146_vm1, %v1412_v4  ;;  %v1703_v4 = vld [vmem:[%s2666_s8] ss:$0 sm:$0xff] }
0x2796   :  { %1912 = vmatprep.mubr.msk.bf16.mxu0 %vm2162_vm0, %v2161_v0 }
0x2868   :  { %v1450_v42 = vpop.f32.mrb[32].mxu0 }
0x2869   :  { %v1457_v43 = vrot.slane %v1450_v42, 2  ;;  %v1898_v5 = vpop.f32.mrb[33].mxu0 }
0x286a   :  { %v1453_v44 = vpop.f32.mrb[34].mxu0 }
0x286b   :  { %v1459_v45 = vadd.f32 %v1457_v43, %v2509_v24  ;;  %v1899_v46 = vpop.f32.mrb[35].mxu0 }
0x286d   :  { %v1460_v47 = vmul.f32 %v1459_v45, %v2331_v34  ;;  %v2013_v45 = vld [vmem:[#allocation2] sm:$0xff] }
0x286f   :  { %2005 = vtanh.f32 %v1460_v47 }
0x2879   :  { %v2006_v48 = vpop.eup %2005 }
0x287a   :  { %v1462_v49 = vmul.f32 %v2006_v48, %v2331_v34 }
0x287c   :  { %v1463_v51 = vadd.f32 %v1462_v49, %v2340_v39 }
0x287e   :  { %1469 = vrot.lane.b32.xlu0 %v1463_v51, %s2165_s4  ;;  %v1467_v56 = vmul.f32 %v1465_v55, %v1463_v51 }
0x28f0   :  { %v1470_v52 = vpop.permute.xlu0 %1469 }
0x28f1   :  { %v1472_v54 = vmul.f32 %v1470_v52, %v1463_v51 }
0x28f3   :  { %1474 = vrot.lane.b32.xlu1 %v1472_v54, %s2165_s4 }
0x2965   :  { %v1475_v57 = vpop.permute.xlu1 %1474 }
0x2966   :  { %v1477_v58 = vadd.f32 %v1475_v57, %v1467_v56 }
0x2968   :  { %2007 = vtanh.f32 %v1477_v58  ;;  %v1541_v18 = vrot.slane %v1477_v58, 7 }
0x2972   :  { %v2008_v59 = vpop.eup %2007 }
0x2973   :  { %1480 = vrot.lane.b32.xlu0 %v2008_v59, %s2165_s4 }
0x29e5   :  { %v1481_v60 = vpop.permute.xlu0 %1480 }
0x29e6   :  { %v1483_v61 = vmul.f32 %v1481_v60, %v1463_v51 }
0x29e8   :  { %v1565_v7 = vsel %vm209_vm7, %v1564_v38, %v1483_v61  ;;  %v1484_v62 = vpack.c.bf16 %v1483_v61, %v1483_v61 }
0x29ea   :  { %v1486_v63 = vrot.slane %v1484_v62, 3 }
0x29ec   :  { %1487 = vrot.lane.b32.xlu1 %v1486_v63, %s2155_s19 }
0x2a5e   :  { %v1488_v1 = vpop.permute.xlu1 %1487 }
0x2a5f   :  { %1905 = vmatmul.mubr.msk.bf16.vlgmr.msra.gmra.mrb[32].mxu1 %vm146_vm1, %v1488_v1 }
0x2b32   :  { %v1526_v2 = vpop.f32.mrb[32].mxu1 }
0x2b33   :  { %v1533_v3 = vrot.slane %v1526_v2, 1  ;;  %v1906_v6 = vpop.f32.mrb[33].mxu1 }
0x2b34   :  { %v1529_v8 = vpop.f32.mrb[34].mxu1 }
0x2b35   :  { %v1535_v9 = vadd.f32 %v1533_v3, %v2509_v24  ;;  %v1907_v10 = vpop.f32.mrb[35].mxu1 }
0x2b37   :  { %v1536_v12 = vmul.f32 %v1535_v9, %v2331_v34 }
0x2b39   :  { %2009 = vtanh.f32 %v1536_v12 }
0x2b43   :  { %v2010_v13 = vpop.eup %2009 }
0x2b44   :  { %v1538_v14 = vmul.f32 %v2010_v13, %v2331_v34  ;;  %v1947_v34 = vld [vmem:[%s2665_s7] sm:$0xff]  }
0x2b45   :  { %1909 = vmatpush3.bf16.msra.mxu0 %v1947_v34 }
0x2b46   :  { %v1539_v15 = vadd.f32 %v1538_v14, %v2340_v39  ;;  %1910 = vmatprep.subr.bf16.mxu0 %v2161_v0 }
0x2b48   :  { %1545 = vrot.lane.b32.xlu0 %v1539_v15, %s2165_s4  ;;  %v1543_v19 = vmul.f32 %v1541_v18, %v1539_v15 }
0x2b49   :  { %1911 = vmatpush3.bf16.msra.mxu0 %v1948_v23 }
0x2bba   :  { %v1546_v16 = vpop.permute.xlu0 %1545 }
0x2bbb   :  { %v1548_v17 = vmul.f32 %v1546_v16, %v1539_v15 }
0x2bbd   :  { %1550 = vrot.lane.b32.xlu1 %v1548_v17, %s2165_s4 }
0x2c2f   :  { %v1551_v20 = vpop.permute.xlu1 %1550 }
0x2c30   :  { %v1553_v21 = vadd.f32 %v1551_v20, %v1543_v19 }
0x2c32   :  { %2011 = vtanh.f32 %v1553_v21 }
0x2c3c   :  { %v2012_v24 = vpop.eup %2011 }
0x2c3d   :  { %1556 = vrot.lane.b32.xlu0 %v2012_v24, %s2165_s4 }
0x2caf   :  { %v1557_v39 = vpop.permute.xlu0 %1556 }
0x2cb0   :  { %v1559_v22 = vmul.f32 %v1557_v39, %v1539_v15 }
0x2cb2   :  { %v1566_v25 = vsel %vm211_vm8, %v1565_v7, %v1559_v22 }
0x2cb3   :  { %v1568_v26 = vrot.slane %v1566_v25, 7  ;;  %v1570_v50 = vrot.slane %v1566_v25, 5  ;;  %v1572_v27 = vrot.slane %v1566_v25, 3  ;;  %v1574_v30 = vrot.slane %v1566_v25, 1 }
0x2cb5   :  { %v1576_v28 = vsel %vm199_vm2, %v1568_v26, %v1570_v50 }
0x2cb6   :  { %v1577_v53 = vsel %vm201_vm3, %v1576_v28, %v1572_v27 }
0x2cb7   :  { %v1578_v31 = vsel %vm203_vm4, %v1577_v53, %v1574_v30 }
0x2cb8   :  { %v1579_v0 = vsel %vm205_vm5, %v1578_v31, %v1568_v26 }
0x2cb9   :  { %v1580_v32 = vsel %vm207_vm6, %v1579_v0, %v1570_v50 }
0x2cba   :  { %v1581_v33 = vsel %vm209_vm7, %v1580_v32, %v1572_v27 }
0x2cbb   :  { %v1582_v29 = vsel %vm211_vm8, %v1581_v33, %v1574_v30 }
0x2cbc   :  { %v1934_v36 = vpack.i.bf16 %v1582_v29, %v1566_v25 }
0x2cbe   :  { %1935 = vrot.lane.b32.xlu1 %v1934_v36, %s2155_s19  ;;  %s2124_s19 = scalar_lea.vmem %s1667_s16, 128 }
0x2cbf   :  { %p2125_p12 = scmp.ne.s32.totalorder %s1667_s16, %s2124_s19  ;;  %p2130_p0 = scmp.lt.s32.totalorder %s2124_s19, %s2124_s19 }
0x2cc1   :  { %p2131_p1 = por %p2130_p0, %p2129_p13 }
0x2cc3   :  { %p2132_p2 = pnand %p2131_p1, %p2125_p12 }
0x2d30   :  { %v1936_v37 = vpop.permute.xlu1 %1935 }
0x2d31   :  { %v1938_v38 = vunpack.i.h.bf16 %v1936_v37  ;;  %v1937_v40 = vunpack.i.l.bf16 %v1936_v37 }
0x2d33   :  { %v1590_v35 = vsel %vm114_vm11, %v1937_v40, %v1938_v38 }
0x2d34   :  { %v1591_v41 = vpack.c.bf16 %v1590_v35, %v1590_v35 }
0x2d36   :  { %1913 = vmatmul.mubr.msk.bf16.vlgmr.msra.gmra.mrb[36].mxu0 %vm146_vm1, %v1591_v41 }
0x2e09   :  { %v1652_v42 = vpop.f32.mrb[36].mxu0 }
0x2e0a   :  { %v1653_v43 = vadd.f32 %v1703_v4, %v1652_v42  ;;  %v1914_v5 = vpop.f32.mrb[37].mxu0 }
0x2e0b   :  { %v1655_v44 = vpop.f32.mrb[38].mxu0 }
0x2e0c   :  { %v1658_v46 = vadd.f32 %v2013_v45, %v1653_v43  ;;  %v1915_v47 = vpop.f32.mrb[39].mxu0 }
0x2e0e   :  { %1659 = vst.msk [vmem:[#allocation11] sm:$0xff] %vm146_vm1, %v1658_v46 }
0x2e0f   :  { %2135 = shalt.err (!%p2132_p2)
}
0x2e10   :  { %s2136_s26 = scalar_lea.hbm %s2667_s9, 128 }
0x2e11   :  { %p2137_p3 = scmp.ne.s32.totalorder %s2667_s9, %s2136_s26  ;;  %p2140_p4 = scmp.lt.u32.totalorder %s2136_s26, %s2667_s9 }
0x2e13   :  { %p2142_p5 = pnand %p2140_p4, %p2137_p3 }
0x2e15   :  { %2145 = shalt.err (!%p2142_p5)
}
0x2e16   :  { %1669 = dma.vmem_to_hbm [thread:$0]  %s1667_s16, 128, %s2667_s9, [#allocation4]  }
0x2e17   :  { %2152 = dma.done.wait [#allocation4], 128  }
0x2e18   :  { %2153 = vsyncadd [#allocation4], 4294967168 }
0x2e19   :  { %1673 = vsyncpa [#allocation3], 1 }
0x2e1a   :  { %1674 = vsyncpa [#allocation6], 1 }
0x2e1b   :  { %1675 = vsyncpa [#allocation9], 1 }
0x2e1c   :  { %1676 = vsyncpa [#allocation4], 1 }

</bundles_post_ra>
